<compile_context>
chip_gen: v7x
topology: tpu7x:2x2x1
jax: 0.10.0
libtpu: 0.0.40
codegen_flags: <defaults>
</compile_context>

<pallas_src>
import math

import jax
import jax.numpy as jnp
from jax.experimental import pallas as pl
from jax.experimental.pallas import tpu as pltpu

EMBED = 256
HEADS = 4
HEAD_DIM = EMBED // HEADS  # 64
SCALE = 1.0 / math.sqrt(HEAD_DIM)


def _attn_kernel(x_ref, kv_ref, kv_len_ref,
                 wq_ref, bq_ref, wkv_ref, bkv_ref, wo_ref, bo_ref,
                 o_ref):
    BB, Tq, E = x_ref.shape
    Tk = kv_ref.shape[1]
    b0 = pl.program_id(0) * BB

    # Flatten the batch block into the matmul row dim so the projection
    # matmuls see BB*Tq rows (fills the MXU instead of 8 of 128/256 rows).
    x = x_ref[...].reshape(BB * Tq, E)
    kvx = kv_ref[...].reshape(BB * Tk, E)

    # Q projection (attention scale folded in) + fused K|V projection
    # (single (E, 2E) MXU pass, contraction kept at 256).
    q = (jnp.dot(x, wq_ref[...], preferred_element_type=jnp.float32)
         + bq_ref[...]) * SCALE
    kvp = jnp.dot(kvx, wkv_ref[...], preferred_element_type=jnp.float32) + bkv_ref[...]
    k = kvp[:, :E]          # lane slice at a 128-multiple boundary
    v = kvp[:, E:]

    # (BB*rows, E) -> (BB*HEADS, rows, HEAD_DIM): head-batched layout so all
    # heads share a single score/softmax/context code path.
    def split_heads(t, rows):
        return (t.reshape(BB, rows, HEADS, HEAD_DIM)
                 .transpose(0, 2, 1, 3)
                 .reshape(BB * HEADS, rows, HEAD_DIM))

    q_h = split_heads(q, Tq)
    k_h = split_heads(k, Tk)
    v_h = split_heads(v, Tk)

    # Key-padding mask from the kv sequence lengths of this batch block.
    lens = kv_len_ref[pl.ds(b0, BB), :]                       # (BB, 1) int32
    key_ids = jax.lax.broadcasted_iota(jnp.int32, (BB, Tq, Tk), 2)
    valid_b = key_ids < lens[:, :, None]                      # (BB, Tq, Tk)
    valid = jnp.broadcast_to(valid_b[:, None], (BB, HEADS, Tq, Tk)).reshape(
        BB * HEADS, Tq, Tk)

    # Head-batched scores + masked softmax + context.
    s = jnp.einsum('bqd,bkd->bqk', q_h, k_h,
                   preferred_element_type=jnp.float32)
    neg = jnp.finfo(s.dtype).min                              # dtype-aware mask
    s = jnp.where(valid, s, neg)
    m = jnp.max(s, axis=-1, keepdims=True)
    p = jnp.exp(s - m)
    p = jnp.where(valid, p, 0.0)          # fully-masked rows -> zero context
    denom = jnp.sum(p, axis=-1, keepdims=True)
    p = p * pl.reciprocal(jnp.maximum(denom, 1e-30), approx=True)

    ctx_h = jnp.einsum('bqk,bkd->bqd', p, v_h,
                       preferred_element_type=jnp.float32)
    ctx = (ctx_h.reshape(BB, HEADS, Tq, HEAD_DIM)
                .transpose(0, 2, 1, 3)
                .reshape(BB * Tq, E))

    out = jnp.dot(ctx, wo_ref[...], preferred_element_type=jnp.float32) + bo_ref[...]
    o_ref[...] = out.reshape(BB, Tq, E).astype(o_ref.dtype)


def _pick_batch_block(B, Tq):
    """Largest divisor of B giving ~<=256 projection rows per grid step."""
    target = max(1, 256 // max(Tq, 1))
    bb = 1
    for d in range(1, B + 1):
        if B % d == 0 and d <= target:
            bb = d
    return bb


def cached_mha_forward(x, cross_attention_input,
                       sequence_lengths, cross_attention_sequence_lengths,
                       params):
    """x: (B, Tq, 256) f32; cross_attention_input: (B, Tk, 256) f32;
    sequence_lengths / cross_attention_sequence_lengths: (B,) int."""
    B, Tq, E = x.shape
    Tk = cross_attention_input.shape[1]
    assert E == EMBED

    wq, bq, wk, bk, wv, bv, wo, bo = params
    # Fused K|V projection weights (one (E, 2E) matmul instead of two (E, E)).
    wkv = jnp.concatenate([wk, wv], axis=1)          # (E, 2E)
    bkv = jnp.concatenate([bk, bv], axis=1)          # (1, 2E)

    kv_lens = cross_attention_sequence_lengths.reshape(B, 1).astype(jnp.int32)
    # TODO(synk): query `sequence_lengths` semantics (cache bookkeeping) not
    # public; not used in this use_cache=False forward pass.
    del sequence_lengths

    BB = _pick_batch_block(B, Tq)
    grid = (B // BB,)

    def w_full(shape):
        # Constant index_map -> DMA'd once; (pipeline_mode=pl.Buffered(1)
        # would additionally halve their VMEM footprint if blocks grow large.)
        return pl.BlockSpec(shape, lambda b: (0, 0))

    grid_spec = pltpu.PrefetchScalarGridSpec(
        num_scalar_prefetch=0,
        grid=grid,
        in_specs=[
            pl.BlockSpec((BB, Tq, E), lambda b: (b, 0, 0)),   # x
            pl.BlockSpec((BB, Tk, E), lambda b: (b, 0, 0)),   # kv
            pl.BlockSpec((B, 1), lambda b: (0, 0)),           # kv lengths (full)
            w_full((E, E)), w_full((1, E)),                   # Wq, bq
            w_full((E, 2 * E)), w_full((1, 2 * E)),           # Wkv, bkv
            w_full((E, E)), w_full((1, E)),                   # Wo, bo
        ],
        out_specs=pl.BlockSpec((BB, Tq, E), lambda b: (b, 0, 0)),
    )

    return pl.pallas_call(
        _attn_kernel,
        out_shape=jax.ShapeDtypeStruct((B, Tq, E), jnp.float32),
        grid_spec=grid_spec,
        compiler_params=pltpu.CompilerParams(
            # Batch blocks are fully independent -> shard across v7x's 2 TCs.
            dimension_semantics=("parallel",)),
    )(x, cross_attention_input, kv_lens,
      wq, bq, wkv, bkv, wo, bo)


def init_params(key):
    """Deterministic synthetic weights. Stored (E_in, E_out); applied as x @ W."""
    ks = jax.random.split(key, 8)
    std = 0.02
    wq = std * jax.random.normal(ks[0], (EMBED, EMBED), jnp.float32)
    wk = std * jax.random.normal(ks[1], (EMBED, EMBED), jnp.float32)
    wv = std * jax.random.normal(ks[2], (EMBED, EMBED), jnp.float32)
    wo = std * jax.random.normal(ks[3], (EMBED, EMBED), jnp.float32)
    bq = std * jax.random.normal(ks[4], (1, EMBED), jnp.float32)
    bk = std * jax.random.normal(ks[5], (1, EMBED), jnp.float32)
    bv = std * jax.random.normal(ks[6], (1, EMBED), jnp.float32)
    bo = std * jax.random.normal(ks[7], (1, EMBED), jnp.float32)
    return (wq, bq, wk, bk, wv, bv, wo, bo)


if __name__ == "__main__":
    key = jax.random.PRNGKey(0)
    k_x, k_kv, k_p = jax.random.split(key, 3)

    B, Tq, Tk = 2, 8, 8
    x = jax.random.normal(k_x, (B, Tq, EMBED), jnp.float32)
    cross_attention_input = jax.random.normal(k_kv, (B, Tk, EMBED), jnp.float32)
    sequence_lengths = jnp.array([8, 6], dtype=jnp.int32)
    cross_attention_sequence_lengths = jnp.array([5, 8], dtype=jnp.int32)

    params = init_params(k_p)

    out = cached_mha_forward(x, cross_attention_input,
                             sequence_lengths,
                             cross_attention_sequence_lengths,
                             params)
    out = jax.block_until_ready(out)
    assert out.shape == (B, Tq, EMBED)
    assert bool(jnp.all(jnp.isfinite(out)))
    print("KERNEL_OK")
</pallas_src>

<mosaic_0001>
module attributes {stable_mosaic.version = 11 : i64} {
  func.func @_attn_kernel(%arg0: i32, %arg1: memref<2x8x256xf32, #tpu.memory_space<vmem>>, %arg2: memref<2x8x256xf32, #tpu.memory_space<vmem>>, %arg3: memref<2x1xi32, #tpu.memory_space<vmem>>, %arg4: memref<256x256xf32, #tpu.memory_space<vmem>>, %arg5: memref<1x256xf32, #tpu.memory_space<vmem>>, %arg6: memref<256x512xf32, #tpu.memory_space<vmem>>, %arg7: memref<1x512xf32, #tpu.memory_space<vmem>>, %arg8: memref<256x256xf32, #tpu.memory_space<vmem>>, %arg9: memref<1x256xf32, #tpu.memory_space<vmem>>, %arg10: memref<2x8x256xf32, #tpu.memory_space<vmem>>) attributes {dimension_semantics = [#tpu.dimension_semantics<parallel>], iteration_bounds = array<i64: 1>, scalar_prefetch = 0 : i64, scratch_operands = 0 : i64, tpu.core_type = #tpu.core_type<tc>, window_params = [{transform_indices = @transform_0, window_bounds = array<i64: 2, 8, 256>}, {transform_indices = @transform_1, window_bounds = array<i64: 2, 8, 256>}, {pipeline_mode = #tpu.pipeline_mode<synchronous>, transform_indices = @transform_2, window_bounds = array<i64: 2, 1>}, {pipeline_mode = #tpu.pipeline_mode<synchronous>, transform_indices = @transform_3, window_bounds = array<i64: 256, 256>}, {pipeline_mode = #tpu.pipeline_mode<synchronous>, transform_indices = @transform_4, window_bounds = array<i64: 1, 256>}, {pipeline_mode = #tpu.pipeline_mode<synchronous>, transform_indices = @transform_5, window_bounds = array<i64: 256, 512>}, {pipeline_mode = #tpu.pipeline_mode<synchronous>, transform_indices = @transform_6, window_bounds = array<i64: 1, 512>}, {pipeline_mode = #tpu.pipeline_mode<synchronous>, transform_indices = @transform_7, window_bounds = array<i64: 256, 256>}, {pipeline_mode = #tpu.pipeline_mode<synchronous>, transform_indices = @transform_8, window_bounds = array<i64: 1, 256>}, {transform_indices = @transform_9, window_bounds = array<i64: 2, 8, 256>}]} {
    %c2_i32 = arith.constant 2 : i32
    %0 = arith.muli %arg0, %c2_i32 : i32
    %c0 = arith.constant 0 : index
    %c0_0 = arith.constant 0 : index
    %c0_1 = arith.constant 0 : index
    %1 = vector.load %arg1[%c0, %c0_0, %c0_1] : memref<2x8x256xf32, #tpu.memory_space<vmem>>, vector<2x8x256xf32>
    %2 = vector.shape_cast %1 : vector<2x8x256xf32> to vector<16x256xf32>
    %c0_2 = arith.constant 0 : index
    %c0_3 = arith.constant 0 : index
    %c0_4 = arith.constant 0 : index
    %3 = vector.load %arg2[%c0_2, %c0_3, %c0_4] : memref<2x8x256xf32, #tpu.memory_space<vmem>>, vector<2x8x256xf32>
    %4 = vector.shape_cast %3 : vector<2x8x256xf32> to vector<16x256xf32>
    %c0_5 = arith.constant 0 : index
    %c0_6 = arith.constant 0 : index
    %5 = vector.load %arg4[%c0_5, %c0_6] : memref<256x256xf32, #tpu.memory_space<vmem>>, vector<256x256xf32>
    %cst = arith.constant dense<0.000000e+00> : vector<16x256xf32>
    %6 = tpu.matmul %2, %5, %cst {dimension_numbers = #tpu.dot_dimension_numbers<[1], [0], [0], [1], [0, 0, 1, 1], [], []>} : vector<16x256xf32>, vector<256x256xf32>, vector<16x256xf32> -> vector<16x256xf32>
    %c0_7 = arith.constant 0 : index
    %c0_8 = arith.constant 0 : index
    %7 = vector.load %arg5[%c0_7, %c0_8] : memref<1x256xf32, #tpu.memory_space<vmem>>, vector<1x256xf32>
    %8 = vector.broadcast %7 : vector<1x256xf32> to vector<16x256xf32>
    %9 = arith.addf %6, %8 : vector<16x256xf32>
    %cst_9 = arith.constant 1.250000e-01 : f32
    %10 = vector.broadcast %cst_9 : f32 to vector<16x256xf32>
    %11 = arith.mulf %9, %10 : vector<16x256xf32>
    %c0_10 = arith.constant 0 : index
    %c0_11 = arith.constant 0 : index
    %12 = vector.load %arg6[%c0_10, %c0_11] : memref<256x512xf32, #tpu.memory_space<vmem>>, vector<256x512xf32>
    %cst_12 = arith.constant dense<0.000000e+00> : vector<16x512xf32>
    %13 = tpu.matmul %4, %12, %cst_12 {dimension_numbers = #tpu.dot_dimension_numbers<[1], [0], [0], [1], [0, 0, 1, 1], [], []>} : vector<16x256xf32>, vector<256x512xf32>, vector<16x512xf32> -> vector<16x512xf32>
    %c0_13 = arith.constant 0 : index
    %c0_14 = arith.constant 0 : index
    %14 = vector.load %arg7[%c0_13, %c0_14] : memref<1x512xf32, #tpu.memory_space<vmem>>, vector<1x512xf32>
    %15 = vector.broadcast %14 : vector<1x512xf32> to vector<16x512xf32>
    %16 = arith.addf %13, %15 : vector<16x512xf32>
    %17 = vector.extract_strided_slice %16 {offsets = [0, 0], sizes = [16, 256], strides = [1, 1]} : vector<16x512xf32> to vector<16x256xf32>
    %18 = vector.extract_strided_slice %16 {offsets = [0, 256], sizes = [16, 256], strides = [1, 1]} : vector<16x512xf32> to vector<16x256xf32>
    %19 = vector.shape_cast %11 : vector<16x256xf32> to vector<2x8x4x64xf32>
    %20 = tpu.transpose %19, [0, 2, 1, 3] : vector<2x8x4x64xf32> -> vector<2x4x8x64xf32>
    %21 = vector.shape_cast %20 : vector<2x4x8x64xf32> to vector<8x8x64xf32>
    %22 = vector.shape_cast %17 : vector<16x256xf32> to vector<2x8x4x64xf32>
    %23 = tpu.transpose %22, [0, 2, 1, 3] : vector<2x8x4x64xf32> -> vector<2x4x8x64xf32>
    %24 = vector.shape_cast %23 : vector<2x4x8x64xf32> to vector<8x8x64xf32>
    %25 = vector.shape_cast %18 : vector<16x256xf32> to vector<2x8x4x64xf32>
    %26 = tpu.transpose %25, [0, 2, 1, 3] : vector<2x8x4x64xf32> -> vector<2x4x8x64xf32>
    %27 = vector.shape_cast %26 : vector<2x4x8x64xf32> to vector<8x8x64xf32>
    %28 = arith.index_cast %0 : i32 to index
    %c0_15 = arith.constant 0 : index
    %29 = vector.load %arg3[%28, %c0_15] : memref<2x1xi32, #tpu.memory_space<vmem>>, vector<2x1xi32>
    %30 = tpu.iota {dimensions = array<i32: 2>} : vector<2x8x8xi32>
    %31 = vector.shape_cast %29 : vector<2x1xi32> to vector<2x1x1xi32>
    %32 = vector.broadcast %31 : vector<2x1x1xi32> to vector<2x8x8xi32>
    %33 = arith.cmpi slt, %30, %32 : vector<2x8x8xi32>
    %34 = vector.shape_cast %33 : vector<2x8x8xi1> to vector<2x1x8x8xi1>
    %35 = vector.shape_cast %34 : vector<2x1x8x8xi1> to vector<2x1x8x8xi1>
    %36 = vector.broadcast %35 : vector<2x1x8x8xi1> to vector<2x4x8x8xi1>
    %37 = vector.shape_cast %36 : vector<2x4x8x8xi1> to vector<8x8x8xi1>
    "tpu.trace_start"() <{level = 10 : i32, message = "bqd,bkd->bqk"}> : () -> ()
    %cst_16 = arith.constant dense<0.000000e+00> : vector<8x8x8xf32>
    %38 = tpu.matmul %21, %24, %cst_16 {dimension_numbers = #tpu.dot_dimension_numbers<[2], [2], [1], [1], [0, 0, 0, 1, 1, 1], [0], [0]>} : vector<8x8x64xf32>, vector<8x8x64xf32>, vector<8x8x8xf32> -> vector<8x8x8xf32>
    %cst_17 = arith.constant -3.40282347E+38 : f32
    "tpu.trace_stop"() : () -> ()
    %39 = vector.broadcast %cst_17 : f32 to vector<8x8x8xf32>
    %40 = arith.select %37, %38, %39 : vector<8x8x8xi1>, vector<8x8x8xf32>
    %cst_18 = arith.constant dense<0xFF800000> : vector<8x8xf32>
    %41 = vector.multi_reduction <maximumf>, %40, %cst_18 [2] : vector<8x8x8xf32> to vector<8x8xf32>
    %42 = vector.shape_cast %41 : vector<8x8xf32> to vector<8x8x1xf32>
    %43 = vector.broadcast %42 : vector<8x8x1xf32> to vector<8x8x8xf32>
    %44 = arith.subf %40, %43 : vector<8x8x8xf32>
    %45 = math.exp %44 : vector<8x8x8xf32>
    %cst_19 = arith.constant 0.000000e+00 : f32
    %46 = vector.broadcast %cst_19 : f32 to vector<8x8x8xf32>
    %47 = arith.select %37, %45, %46 : vector<8x8x8xi1>, vector<8x8x8xf32>
    %cst_20 = arith.constant dense<0.000000e+00> : vector<8x8xf32>
    %48 = vector.multi_reduction <add>, %47, %cst_20 [2] : vector<8x8x8xf32> to vector<8x8xf32>
    %49 = vector.shape_cast %48 : vector<8x8xf32> to vector<8x8x1xf32>
    %cst_21 = arith.constant 1.000000e-30 : f32
    %50 = vector.broadcast %cst_21 : f32 to vector<8x8x1xf32>
    %51 = arith.maximumf %49, %50 : vector<8x8x1xf32>
    %52 = tpu.reciprocal %51 {approx = true} : vector<8x8x1xf32> -> vector<8x8x1xf32>
    %53 = vector.broadcast %52 : vector<8x8x1xf32> to vector<8x8x8xf32>
    %54 = arith.mulf %47, %53 : vector<8x8x8xf32>
    "tpu.trace_start"() <{level = 10 : i32, message = "bqk,bkd->bqd"}> : () -> ()
    %cst_22 = arith.constant dense<0.000000e+00> : vector<8x8x64xf32>
    %55 = tpu.matmul %54, %27, %cst_22 {dimension_numbers = #tpu.dot_dimension_numbers<[2], [1], [1], [2], [0, 0, 0, 1, 1, 2], [0], [0]>} : vector<8x8x8xf32>, vector<8x8x64xf32>, vector<8x8x64xf32> -> vector<8x8x64xf32>
    "tpu.trace_stop"() : () -> ()
    %56 = vector.shape_cast %55 : vector<8x8x64xf32> to vector<2x4x8x64xf32>
    %57 = tpu.transpose %56, [0, 2, 1, 3] : vector<2x4x8x64xf32> -> vector<2x8x4x64xf32>
    %58 = vector.shape_cast %57 : vector<2x8x4x64xf32> to vector<16x256xf32>
    %c0_23 = arith.constant 0 : index
    %c0_24 = arith.constant 0 : index
    %59 = vector.load %arg8[%c0_23, %c0_24] : memref<256x256xf32, #tpu.memory_space<vmem>>, vector<256x256xf32>
    %cst_25 = arith.constant dense<0.000000e+00> : vector<16x256xf32>
    %60 = tpu.matmul %58, %59, %cst_25 {dimension_numbers = #tpu.dot_dimension_numbers<[1], [0], [0], [1], [0, 0, 1, 1], [], []>} : vector<16x256xf32>, vector<256x256xf32>, vector<16x256xf32> -> vector<16x256xf32>
    %c0_26 = arith.constant 0 : index
    %c0_27 = arith.constant 0 : index
    %61 = vector.load %arg9[%c0_26, %c0_27] : memref<1x256xf32, #tpu.memory_space<vmem>>, vector<1x256xf32>
    %62 = vector.broadcast %61 : vector<1x256xf32> to vector<16x256xf32>
    %63 = arith.addf %60, %62 : vector<16x256xf32>
    %64 = vector.shape_cast %63 : vector<16x256xf32> to vector<2x8x256xf32>
    %c0_28 = arith.constant 0 : index
    %c0_29 = arith.constant 0 : index
    %c0_30 = arith.constant 0 : index
    %65 = vector.load %arg10[%c0_28, %c0_29, %c0_30] : memref<2x8x256xf32, #tpu.memory_space<vmem>>, vector<2x8x256xf32>
    tpu.vector_store %arg10[%c0_28, %c0_29, %c0_30], %64 {strides = array<i32>} : memref<2x8x256xf32, #tpu.memory_space<vmem>>, vector<2x8x256xf32>,
    return
  }
  func.func @transform_0(%arg0: i32) -> (i32, i32, i32) {
    %c0_i32 = arith.constant 0 : i32
    %c0_i32_0 = arith.constant 0 : i32
    %c0_i32_1 = arith.constant 0 : i32
    return %arg0, %c0_i32, %c0_i32_0 : i32, i32, i32
  }
  func.func @transform_1(%arg0: i32) -> (i32, i32, i32) {
    %c0_i32 = arith.constant 0 : i32
    %c0_i32_0 = arith.constant 0 : i32
    %c0_i32_1 = arith.constant 0 : i32
    return %arg0, %c0_i32, %c0_i32_0 : i32, i32, i32
  }
  func.func @transform_2(%arg0: i32) -> (i32, i32) {
    %c0_i32 = arith.constant 0 : i32
    %c0_i32_0 = arith.constant 0 : i32
    %c0_i32_1 = arith.constant 0 : i32
    return %c0_i32, %c0_i32_0 : i32, i32
  }
  func.func @transform_3(%arg0: i32) -> (i32, i32) {
    %c0_i32 = arith.constant 0 : i32
    %c0_i32_0 = arith.constant 0 : i32
    %c0_i32_1 = arith.constant 0 : i32
    return %c0_i32, %c0_i32_0 : i32, i32
  }
  func.func @transform_4(%arg0: i32) -> (i32, i32) {
    %c0_i32 = arith.constant 0 : i32
    %c0_i32_0 = arith.constant 0 : i32
    %c0_i32_1 = arith.constant 0 : i32
    return %c0_i32, %c0_i32_0 : i32, i32
  }
  func.func @transform_5(%arg0: i32) -> (i32, i32) {
    %c0_i32 = arith.constant 0 : i32
    %c0_i32_0 = arith.constant 0 : i32
    %c0_i32_1 = arith.constant 0 : i32
    return %c0_i32, %c0_i32_0 : i32, i32
  }
  func.func @transform_6(%arg0: i32) -> (i32, i32) {
    %c0_i32 = arith.constant 0 : i32
    %c0_i32_0 = arith.constant 0 : i32
    %c0_i32_1 = arith.constant 0 : i32
    return %c0_i32, %c0_i32_0 : i32, i32
  }
  func.func @transform_7(%arg0: i32) -> (i32, i32) {
    %c0_i32 = arith.constant 0 : i32
    %c0_i32_0 = arith.constant 0 : i32
    %c0_i32_1 = arith.constant 0 : i32
    return %c0_i32, %c0_i32_0 : i32, i32
  }
  func.func @transform_8(%arg0: i32) -> (i32, i32) {
    %c0_i32 = arith.constant 0 : i32
    %c0_i32_0 = arith.constant 0 : i32
    %c0_i32_1 = arith.constant 0 : i32
    return %c0_i32, %c0_i32_0 : i32, i32
  }
  func.func @transform_9(%arg0: i32) -> (i32, i32, i32) {
    %c0_i32 = arith.constant 0 : i32
    %c0_i32_0 = arith.constant 0 : i32
    %c0_i32_1 = arith.constant 0 : i32
    return %arg0, %c0_i32, %c0_i32_0 : i32, i32, i32
  }
}

</mosaic_0001>

<bundles_post_ra>
// kernel: tpu_custom_call.1
= control target key start
LH: loop header
LB: loop body
LE: loop exit
PB: predicated region body
PF: predicated region fallthrough
CT: control target
= control target key end

     0   :  { %14 = vsyncpa [#allocation3], 0  ;;  %s4552_s0 = inlined_call_operand.hbm [shape: f32[2,8,256], index: 0, kind: input, shape index: {}]   ;;  %s4553_s1 = inlined_call_operand.hbm [shape: f32[2,8,256], index: 1, kind: input, shape index: {}]   ;;  %s4554_s2 = inlined_call_operand.vmem [shape: s32[2,1], index: 2, kind: input, shape index: {}]   ;;  %s4555_s3 = inlined_call_operand.hbm [shape: f32[256,256], index: 3, kind: input, shape index: {}]   ;;  %s4556_s4 = inlined_call_operand.vmem [shape: f32[1,256], index: 4, kind: input, shape index: {}]   ;;  %s4557_s5 = inlined_call_operand.hbm [shape: f32[256,512], index: 5, kind: input, shape index: {}]   ;;  %s4558_s6 = inlined_call_operand.vmem [shape: f32[1,512], index: 6, kind: input, shape index: {}]   ;;  %s4559_s7 = inlined_call_operand.hbm [shape: f32[256,256], index: 7, kind: input, shape index: {}]   ;;  %s4560_s8 = inlined_call_operand.vmem [shape: f32[1,256], index: 8, kind: input, shape index: {}]   ;;  %s4561_s9 = inlined_call_operand.hbm [shape: f32[2,8,256], index: 9, kind: output, shape index: {}]  }
   0x1   :  { %15 = vsyncpa [#allocation6], 0 }
   0x2   :  { %16 = vsyncpa [#allocation9], 0 }
   0x3   :  { %17 = vsyncpa [#allocation4], 0  ;;  %s3865_s30 = smov [#allocation5]   ;;  %s3866_s11 = smov [#allocation8]  }
   0x4   :  { %s35_s10 = sshll.u32 %s3865_s30, 4  ;;  %s63_s12 = sshll.u32 %s3866_s11, 4  ;;  %s36_s10 = int_to_ptr.vmem [resolvable:$true] %s35_s10  ;;  %s3932_s12 = int_to_ptr.vmem [resolvable:$true] %s63_s12 }
   0x5   :  { %s3725_s15 = scalar_lea.hbm %s4553_s1, 512 }
   0x6   :  { %p3726_p0 = scmp.ne.s32.totalorder %s4553_s1, %s3725_s15  ;;  %p3729_p1 = scmp.lt.u32.totalorder %s3725_s15, %s4553_s1 }
   0x8   :  { %p3731_p2 = pnand %p3729_p1, %p3726_p0 }
   0xa   :  { %3734 = shalt.err (!%p3731_p2)
}
   0xb   :  { %s3735_s20 = scalar_lea.vmem %s36_s10, 512  ;;  %p3740_p4 = scmp.lt.s32.totalorder %s36_s10, %s36_s10 }
   0xc   :  { %p3736_p3 = scmp.ne.s32.totalorder %s36_s10, %s3735_s20  ;;  %p3741_p5 = scmp.lt.s32.totalorder %s3735_s20, %s3735_s20 }
   0xe   :  { %p3742_p6 = por %p3741_p5, %p3740_p4 }
  0x10   :  { %p3743_p7 = pnand %p3742_p6, %p3736_p3 }
  0x12   :  { %3746 = shalt.err (!%p3743_p7)
}
  0x13   :  { %s3867_s21 = smov 256   ;;  %s3868_s22 = smov 16  }
  0x14   :  { %41 = dma.hbm_to_vmem [thread:$0]  %s4553_s1, 512, %s36_s10, [#allocation6], %s3867_s21, %s3867_s21, %s3868_s22  }
  0x15   :  { %s3747_s27 = scalar_lea.hbm %s4557_s5, 16384 }
  0x16   :  { %p3748_p8 = scmp.ne.s32.totalorder %s4557_s5, %s3747_s27  ;;  %p3751_p9 = scmp.lt.u32.totalorder %s3747_s27, %s4557_s5 }
  0x18   :  { %p3753_p10 = pnand %p3751_p9, %p3748_p8 }
  0x1a   :  { %3756 = shalt.err (!%p3753_p10)
}
  0x1b   :  { %s3757_s13 = scalar_lea.vmem %s3932_s12, 16384  ;;  %p3762_p12 = scmp.lt.s32.totalorder %s3932_s12, %s3932_s12 }
  0x1c   :  { %p3758_p11 = scmp.ne.s32.totalorder %s3932_s12, %s3757_s13  ;;  %p3763_p13 = scmp.lt.s32.totalorder %s3757_s13, %s3757_s13 }
  0x1e   :  { %p3764_p0 = por %p3763_p13, %p3762_p12 }
  0x20   :  { %p3765_p1 = pnand %p3764_p0, %p3758_p11 }
  0x22   :  { %3768 = shalt.err (!%p3765_p1)
}
  0x23   :  { %s3869_s1 = smov 512   ;;  %s3870_s10 = smov 32  }
  0x24   :  { %69 = dma.hbm_to_vmem [thread:$0]  %s4557_s5, 16384, %s3932_s12, [#allocation9], %s3869_s1, %s3869_s1, %s3870_s10  }
  0x25   :  { %s3871_s16 = smov [#allocation2]   ;;  %s3872_s18 = smov [#allocation7]  }
  0x26   :  { %s23_s17 = sshll.u32 %s3871_s16, 4  ;;  %s49_s19 = sshll.u32 %s3872_s18, 4  ;;  %s24_s17 = int_to_ptr.vmem [resolvable:$true] %s23_s17  ;;  %s3966_s19 = int_to_ptr.vmem [resolvable:$true] %s49_s19 }
  0x27   :  { %s3769_s24 = scalar_lea.hbm %s4552_s0, 512 }
  0x28   :  { %p3770_p2 = scmp.ne.s32.totalorder %s4552_s0, %s3769_s24  ;;  %p3773_p3 = scmp.lt.u32.totalorder %s3769_s24, %s4552_s0 }
  0x2a   :  { %p3775_p4 = pnand %p3773_p3, %p3770_p2 }
  0x2c   :  { %3778 = shalt.err (!%p3775_p4)
}
  0x2d   :  { %s3779_s5 = scalar_lea.vmem %s24_s17, 512  ;;  %p3784_p6 = scmp.lt.s32.totalorder %s24_s17, %s24_s17 }
  0x2e   :  { %p3780_p5 = scmp.ne.s32.totalorder %s24_s17, %s3779_s5  ;;  %p3785_p7 = scmp.lt.s32.totalorder %s3779_s5, %s3779_s5 }
  0x30   :  { %p3786_p8 = por %p3785_p7, %p3784_p6 }
  0x32   :  { %p3787_p9 = pnand %p3786_p8, %p3780_p5 }
  0x34   :  { %3790 = shalt.err (!%p3787_p9)
}
  0x35   :  { %29 = dma.hbm_to_vmem [thread:$0]  %s4552_s0, 512, %s24_s17, [#allocation3], %s3867_s21, %s3867_s21, %s3868_s22  }
  0x36   :  { %s3791_s13 = scalar_lea.hbm %s4555_s3, 8192 }
  0x37   :  { %p3792_p10 = scmp.ne.s32.totalorder %s4555_s3, %s3791_s13  ;;  %p3795_p11 = scmp.lt.u32.totalorder %s3791_s13, %s4555_s3 }
  0x39   :  { %p3797_p12 = pnand %p3795_p11, %p3792_p10 }
  0x3b   :  { %3800 = shalt.err (!%p3797_p12)
}
  0x3c   :  { %s3801_s16 = scalar_lea.vmem %s3966_s19, 8192  ;;  %p3806_p0 = scmp.lt.s32.totalorder %s3966_s19, %s3966_s19 }
  0x3d   :  { %p3802_p13 = scmp.ne.s32.totalorder %s3966_s19, %s3801_s16  ;;  %p3807_p1 = scmp.lt.s32.totalorder %s3801_s16, %s3801_s16 }
  0x3f   :  { %p3808_p2 = por %p3807_p1, %p3806_p0 }
  0x41   :  { %p3809_p3 = pnand %p3808_p2, %p3802_p13 }
  0x43   :  { %3812 = shalt.err (!%p3809_p3)
}
  0x44   :  { %55 = dma.hbm_to_vmem [thread:$0]  %s4555_s3, 8192, %s3966_s19, [#allocation6], %s3867_s21, %s3867_s21, %s3868_s22  }
  0x45   :  { %s3873_s18 = smov [#allocation10]   ;;  %s3813_s25 = scalar_lea.hbm %s4559_s7, 8192 }
  0x46   :  { %s77_s20 = sshll.u32 %s3873_s18, 4  ;;  %p3814_p4 = scmp.ne.s32.totalorder %s4559_s7, %s3813_s25  ;;  %s78_s20 = int_to_ptr.vmem [resolvable:$true] %s77_s20 }
  0x47   :  { %p3817_p5 = scmp.lt.u32.totalorder %s3813_s25, %s4559_s7 }
  0x49   :  { %p3819_p6 = pnand %p3817_p5, %p3814_p4 }
  0x4b   :  { %3822 = shalt.err (!%p3819_p6)
}
  0x4c   :  { %s3823_s12 = scalar_lea.vmem %s78_s20, 8192  ;;  %p3828_p8 = scmp.lt.s32.totalorder %s78_s20, %s78_s20 }
  0x4d   :  { %p3824_p7 = scmp.ne.s32.totalorder %s78_s20, %s3823_s12  ;;  %p3829_p9 = scmp.lt.s32.totalorder %s3823_s12, %s3823_s12 }
  0x4f   :  { %p3830_p10 = por %p3829_p9, %p3828_p8 }
  0x51   :  { %p3831_p11 = pnand %p3830_p10, %p3824_p7 }
  0x53   :  { %3834 = shalt.err (!%p3831_p11)
}
  0x54   :  { %83 = dma.hbm_to_vmem [thread:$0]  %s4559_s7, 8192, %s78_s20, [#allocation9], %s3867_s21, %s3867_s21, %s3868_s22  }
  0x55   :  { %3857 = dma.done.wait [#allocation3], 512  }
  0x56   :  { %3858 = vsyncadd [#allocation3], 4294966784 }
  0x57   :  { %3859 = dma.done.wait [#allocation6], 8704  }
  0x58   :  { %3860 = vsyncadd [#allocation6], 4294958592 }
  0x59   :  { %3861 = dma.done.wait [#allocation9], 24576  }
  0x5a   :  { %3862 = vsyncadd [#allocation9], 4294942720  ;;  %v111_v0 = vld [vmem:[#allocation7 + $0x8] sm:$0xff]  ;;  %v113_v1 = vld [vmem:[#allocation7 + $0x18] sm:$0xff]  ;;  %vm3876_vm0 = vmmov 0   ;;  %vm1481_vm1 = vcmask 523264  }
  0x5b   :  { %v268_v2 = vld [vmem:[#allocation8 + $0x8] sm:$0xff]  ;;  %v3408_v3 = vpack.c.bf16 %v113_v1, %v111_v0  ;;  %v110_v5 = vld [vmem:[#allocation7] sm:$0xff]  ;;  %v112_v6 = vld [vmem:[#allocation7 + $0x10] sm:$0xff]  ;;  %vm2098_vm3 = vcmask 64512   ;;  %s3881_s10 = smov [#allocation11]  }
  0x5c   :  { %v272_v4 = vld [vmem:[#allocation8 + $0x28] sm:$0xff]  ;;  %v3410_v8 = vpack.c.bf16 %v112_v6, %v110_v5  ;;  %v267_v9 = vld [vmem:[#allocation8] sm:$0xff]  ;;  %v117_v13 = vld [vmem:[#allocation7 + $0x38] sm:$0xff]  ;;  %s3241_s14 = sshll.u32 %s3881_s10, 4  ;;  %s3242_s14 = int_to_ptr.vmem [resolvable:$true] %s3241_s14 }
  0x5d   :  { %v3472_v7 = vpack.c.bf16 %v272_v4, %v268_v2  ;;  %v271_v10 = vld [vmem:[#allocation8 + $0x20] sm:$0xff]  ;;  %v115_v11 = vld [vmem:[#allocation7 + $0x28] sm:$0xff]  ;;  %3409 = vmatprep.subr.bf16.mxu0 %v3408_v3  ;;  %v116_v19 = vld [vmem:[#allocation7 + $0x30] sm:$0xff]  ;;  %p3840_p13 = scmp.lt.s32.totalorder %s3242_s14, %s3242_s14 }
  0x5e   :  { %v3474_v12 = vpack.c.bf16 %v271_v10, %v267_v9  ;;  %v276_v14 = vld [vmem:[#allocation8 + $0x48] sm:$0xff]  ;;  %3411 = vmatpush1.bf16.msra.mxu0 %v3410_v8  ;;  %v3412_v16 = vpack.c.bf16 %v117_v13, %v115_v11  ;;  %v114_v18 = vld [vmem:[#allocation7 + $0x20] sm:$0xff]  ;;  %v121_v24 = vld [vmem:[#allocation7 + $0x58] sm:$0xff] }
  0x5f   :  { %v280_v15 = vld [vmem:[#allocation8 + $0x68] sm:$0xff]  ;;  %3473 = vmatprep.subr.bf16.mxu1 %v3472_v7  ;;  %v275_v20 = vld [vmem:[#allocation8 + $0x40] sm:$0xff]  ;;  %v3414_v21 = vpack.c.bf16 %v116_v19, %v114_v18  ;;  %v120_v31 = vld [vmem:[#allocation7 + $0x50] sm:$0xff] }
  0x60   :  { %v3476_v17 = vpack.c.bf16 %v280_v15, %v276_v14  ;;  %3475 = vmatpush1.bf16.msra.mxu1 %v3474_v12  ;;  %v279_v22 = vld [vmem:[#allocation8 + $0x60] sm:$0xff]  ;;  %v119_v23 = vld [vmem:[#allocation7 + $0x48] sm:$0xff]  ;;  %3413 = vmatprep.subr.bf16.mxu0 %v3412_v16  ;;  %v125_v36 = vld [vmem:[#allocation7 + $0x78] sm:$0xff] }
  0x61   :  { %v3478_v25 = vpack.c.bf16 %v279_v22, %v275_v20  ;;  %v3416_v26 = vpack.c.bf16 %v121_v24, %v119_v23  ;;  %v284_v27 = vld [vmem:[#allocation8 + $0x88] sm:$0xff]  ;;  %v118_v29 = vld [vmem:[#allocation7 + $0x40] sm:$0xff]  ;;  %v124_v42 = vld [vmem:[#allocation7 + $0x70] sm:$0xff] }
  0x62   :  { %3477 = vmatprep.subr.bf16.mxu1 %v3476_v17  ;;  %v288_v28 = vld [vmem:[#allocation8 + $0xa8] sm:$0xff]  ;;  %v283_v32 = vld [vmem:[#allocation8 + $0x80] sm:$0xff]  ;;  %3415 = vmatpush1.bf16.msra.mxu0 %v3414_v21  ;;  %v3418_v34 = vpack.c.bf16 %v120_v31, %v118_v29  ;;  %v129_v47 = vld [vmem:[#allocation7 + $0x98] sm:$0xff] }
  0x63   :  { %v3480_v30 = vpack.c.bf16 %v288_v28, %v284_v27  ;;  %v287_v33 = vld [vmem:[#allocation8 + $0xa0] sm:$0xff]  ;;  %v123_v35 = vld [vmem:[#allocation7 + $0x68] sm:$0xff]  ;;  %3417 = vmatprep.subr.bf16.mxu0 %v3416_v26  ;;  %v128_v54 = vld [vmem:[#allocation7 + $0x90] sm:$0xff] }
  0x64   :  { %v292_v37 = vld [vmem:[#allocation8 + $0xc8] sm:$0xff]  ;;  %3479 = vmatpush1.bf16.msra.mxu1 %v3478_v25  ;;  %v3482_v38 = vpack.c.bf16 %v287_v33, %v283_v32  ;;  %v3420_v39 = vpack.c.bf16 %v125_v36, %v123_v35  ;;  %v122_v41 = vld [vmem:[#allocation7 + $0x60] sm:$0xff]  ;;  %v133_v59 = vld [vmem:[#allocation7 + $0xb8] sm:$0xff] }
  0x65   :  { %v296_v40 = vld [vmem:[#allocation8 + $0xe8] sm:$0xff]  ;;  %3481 = vmatprep.subr.bf16.mxu1 %v3480_v30  ;;  %v291_v44 = vld [vmem:[#allocation8 + $0xc0] sm:$0xff]  ;;  %v3422_v50 = vpack.c.bf16 %v124_v42, %v122_v41  ;;  %v132_v2 = vld [vmem:[#allocation7 + $0xb0] sm:$0xff] }
  0x66   :  { %v3484_v43 = vpack.c.bf16 %v296_v40, %v292_v37  ;;  %v295_v45 = vld [vmem:[#allocation8 + $0xe0] sm:$0xff]  ;;  %v127_v46 = vld [vmem:[#allocation7 + $0x88] sm:$0xff]  ;;  %3419 = vmatpush1.bf16.msra.mxu0 %v3418_v34  ;;  %v137_v7 = vld [vmem:[#allocation7 + $0xd8] sm:$0xff] }
  0x67   :  { %v300_v48 = vld [vmem:[#allocation8 + $0x108] sm:$0xff]  ;;  %3421 = vmatprep.subr.bf16.mxu0 %v3420_v39  ;;  %v3486_v51 = vpack.c.bf16 %v295_v45, %v291_v44  ;;  %v3424_v52 = vpack.c.bf16 %v129_v47, %v127_v46  ;;  %v126_v53 = vld [vmem:[#allocation7 + $0x80] sm:$0xff]  ;;  %v136_v14 = vld [vmem:[#allocation7 + $0xd0] sm:$0xff] }
  0x68   :  { %v304_v49 = vld [vmem:[#allocation8 + $0x128] sm:$0xff]  ;;  %3483 = vmatpush1.bf16.msra.mxu1 %v3482_v38  ;;  %v299_v55 = vld [vmem:[#allocation8 + $0x100] sm:$0xff]  ;;  %v3426_v62 = vpack.c.bf16 %v128_v54, %v126_v53  ;;  %v141_v19 = vld [vmem:[#allocation7 + $0xf8] sm:$0xff] }
  0x69   :  { %3485 = vmatprep.subr.bf16.mxu1 %v3484_v43  ;;  %v3488_v56 = vpack.c.bf16 %v304_v49, %v300_v48  ;;  %v303_v57 = vld [vmem:[#allocation8 + $0x120] sm:$0xff]  ;;  %v131_v58 = vld [vmem:[#allocation7 + $0xa8] sm:$0xff]  ;;  %v140_v26 = vld [vmem:[#allocation7 + $0xf0] sm:$0xff] }
  0x6a   :  { %v308_v60 = vld [vmem:[#allocation8 + $0x148] sm:$0xff]  ;;  %3423 = vmatpush1.bf16.msra.mxu0 %v3422_v50  ;;  %v3490_v63 = vpack.c.bf16 %v303_v57, %v299_v55  ;;  %v3428_v0 = vpack.c.bf16 %v133_v59, %v131_v58  ;;  %v130_v1 = vld [vmem:[#allocation7 + $0xa0] sm:$0xff]  ;;  %v145_v31 = vld [vmem:[#allocation7 + $0x118] sm:$0xff] }
  0x6b   :  { %v312_v61 = vld [vmem:[#allocation8 + $0x168] sm:$0xff]  ;;  %3425 = vmatprep.subr.bf16.mxu0 %v3424_v52  ;;  %v307_v3 = vld [vmem:[#allocation8 + $0x140] sm:$0xff]  ;;  %v3430_v10 = vpack.c.bf16 %v132_v2, %v130_v1  ;;  %v144_v38 = vld [vmem:[#allocation7 + $0x110] sm:$0xff] }
  0x6c   :  { %3487 = vmatpush1.bf16.msra.mxu1 %v3486_v51  ;;  %v3492_v4 = vpack.c.bf16 %v312_v61, %v308_v60  ;;  %v311_v5 = vld [vmem:[#allocation8 + $0x160] sm:$0xff]  ;;  %v135_v6 = vld [vmem:[#allocation7 + $0xc8] sm:$0xff]  ;;  %v149_v43 = vld [vmem:[#allocation7 + $0x138] sm:$0xff] }
  0x6d   :  { %3489 = vmatprep.subr.bf16.mxu1 %v3488_v56  ;;  %v316_v8 = vld [vmem:[#allocation8 + $0x188] sm:$0xff]  ;;  %v3494_v11 = vpack.c.bf16 %v311_v5, %v307_v3  ;;  %v3432_v12 = vpack.c.bf16 %v137_v7, %v135_v6  ;;  %v134_v13 = vld [vmem:[#allocation7 + $0xc0] sm:$0xff]  ;;  %v148_v50 = vld [vmem:[#allocation7 + $0x130] sm:$0xff] }
  0x6e   :  { %v320_v9 = vld [vmem:[#allocation8 + $0x1a8] sm:$0xff]  ;;  %3427 = vmatpush1.bf16.msra.mxu0 %v3426_v62  ;;  %v315_v15 = vld [vmem:[#allocation8 + $0x180] sm:$0xff]  ;;  %v3434_v22 = vpack.c.bf16 %v136_v14, %v134_v13  ;;  %v153_v55 = vld [vmem:[#allocation7 + $0x158] sm:$0xff] }
  0x6f   :  { %3429 = vmatprep.subr.bf16.mxu0 %v3428_v0  ;;  %v3496_v16 = vpack.c.bf16 %v320_v9, %v316_v8  ;;  %v319_v17 = vld [vmem:[#allocation8 + $0x1a0] sm:$0xff]  ;;  %v139_v18 = vld [vmem:[#allocation7 + $0xe8] sm:$0xff]  ;;  %v152_v62 = vld [vmem:[#allocation7 + $0x150] sm:$0xff] }
  0x70   :  { %3491 = vmatpush1.bf16.msra.mxu1 %v3490_v63  ;;  %v324_v20 = vld [vmem:[#allocation8 + $0x1c8] sm:$0xff]  ;;  %v3498_v23 = vpack.c.bf16 %v319_v17, %v315_v15  ;;  %v3436_v24 = vpack.c.bf16 %v141_v19, %v139_v18  ;;  %v138_v25 = vld [vmem:[#allocation7 + $0xe0] sm:$0xff]  ;;  %v157_v3 = vld [vmem:[#allocation7 + $0x178] sm:$0xff] }
  0x71   :  { %3493 = vmatprep.subr.bf16.mxu1 %v3492_v4  ;;  %v328_v21 = vld [vmem:[#allocation8 + $0x1e8] sm:$0xff]  ;;  %v323_v27 = vld [vmem:[#allocation8 + $0x1c0] sm:$0xff]  ;;  %v3438_v34 = vpack.c.bf16 %v140_v26, %v138_v25  ;;  %v161_v15 = vld [vmem:[#allocation7 + $0x198] sm:$0xff] }
  0x72   :  { %3431 = vmatpush1.bf16.msra.mxu0 %v3430_v10  ;;  %v3500_v28 = vpack.c.bf16 %v328_v21, %v324_v20  ;;  %v327_v29 = vld [vmem:[#allocation8 + $0x1e0] sm:$0xff]  ;;  %v143_v30 = vld [vmem:[#allocation7 + $0x108] sm:$0xff]  ;;  %v156_v10 = vld [vmem:[#allocation7 + $0x170] sm:$0xff] }
  0x73   :  { %3433 = vmatprep.subr.bf16.mxu0 %v3432_v12  ;;  %v332_v32 = vld [vmem:[#allocation8 + $0x208] sm:$0xff]  ;;  %v3502_v35 = vpack.c.bf16 %v327_v29, %v323_v27  ;;  %v3440_v36 = vpack.c.bf16 %v145_v31, %v143_v30  ;;  %v142_v37 = vld [vmem:[#allocation7 + $0x100] sm:$0xff]  ;;  %v165_v29 = vld [vmem:[#allocation7 + $0x1b8] sm:$0xff] }
  0x74   :  { %3495 = vmatpush1.bf16.msra.mxu1 %v3494_v11  ;;  %v336_v33 = vld [vmem:[#allocation8 + $0x228] sm:$0xff]  ;;  %v331_v39 = vld [vmem:[#allocation8 + $0x200] sm:$0xff]  ;;  %v3442_v46 = vpack.c.bf16 %v144_v38, %v142_v37 }
  0x75   :  { %3497 = vmatprep.subr.bf16.mxu1 %v3496_v16  ;;  %v3504_v40 = vpack.c.bf16 %v336_v33, %v332_v32  ;;  %v335_v41 = vld [vmem:[#allocation8 + $0x220] sm:$0xff]  ;;  %v147_v42 = vld [vmem:[#allocation7 + $0x128] sm:$0xff] }
  0x76   :  { %3435 = vmatpush1.bf16.msra.mxu0 %v3434_v22  ;;  %v340_v44 = vld [vmem:[#allocation8 + $0x248] sm:$0xff]  ;;  %v3506_v47 = vpack.c.bf16 %v335_v41, %v331_v39  ;;  %v3444_v48 = vpack.c.bf16 %v149_v43, %v147_v42  ;;  %v146_v49 = vld [vmem:[#allocation7 + $0x120] sm:$0xff]  ;;  %v169_v41 = vld [vmem:[#allocation7 + $0x1d8] sm:$0xff] }
  0x77   :  { %3437 = vmatprep.subr.bf16.mxu0 %v3436_v24  ;;  %v344_v45 = vld [vmem:[#allocation8 + $0x268] sm:$0xff]  ;;  %v339_v51 = vld [vmem:[#allocation8 + $0x240] sm:$0xff]  ;;  %v3446_v58 = vpack.c.bf16 %v148_v50, %v146_v49  ;;  %v160_v24 = vld [vmem:[#allocation7 + $0x190] sm:$0xff] }
  0x78   :  { %3499 = vmatpush1.bf16.msra.mxu1 %v3498_v23  ;;  %v3508_v52 = vpack.c.bf16 %v344_v45, %v340_v44  ;;  %v343_v53 = vld [vmem:[#allocation8 + $0x260] sm:$0xff]  ;;  %v151_v54 = vld [vmem:[#allocation7 + $0x148] sm:$0xff] }
  0x79   :  { %3501 = vmatprep.subr.bf16.mxu1 %v3500_v28  ;;  %v348_v56 = vld [vmem:[#allocation8 + $0x288] sm:$0xff]  ;;  %v3510_v59 = vpack.c.bf16 %v343_v53, %v339_v51  ;;  %v3448_v60 = vpack.c.bf16 %v153_v55, %v151_v54  ;;  %v150_v61 = vld [vmem:[#allocation7 + $0x140] sm:$0xff]  ;;  %v173_v53 = vld [vmem:[#allocation7 + $0x1f8] sm:$0xff] }
  0x7a   :  { %3439 = vmatpush1.bf16.msra.mxu0 %v3438_v34  ;;  %v352_v57 = vld [vmem:[#allocation8 + $0x2a8] sm:$0xff]  ;;  %v347_v63 = vld [vmem:[#allocation8 + $0x280] sm:$0xff]  ;;  %v3450_v6 = vpack.c.bf16 %v152_v62, %v150_v61 }
  0x7b   :  { %3441 = vmatprep.subr.bf16.mxu0 %v3440_v36  ;;  %v3512_v0 = vpack.c.bf16 %v352_v57, %v348_v56  ;;  %v351_v1 = vld [vmem:[#allocation8 + $0x2a0] sm:$0xff]  ;;  %v155_v2 = vld [vmem:[#allocation7 + $0x168] sm:$0xff]  ;;  %v164_v36 = vld [vmem:[#allocation7 + $0x1b0] sm:$0xff] }
  0x7c   :  { %3503 = vmatpush1.bf16.msra.mxu1 %v3502_v35  ;;  %v356_v4 = vld [vmem:[#allocation8 + $0x2c8] sm:$0xff]  ;;  %v154_v7 = vld [vmem:[#allocation7 + $0x160] sm:$0xff]  ;;  %v3514_v8 = vpack.c.bf16 %v351_v1, %v347_v63  ;;  %v3452_v9 = vpack.c.bf16 %v157_v3, %v155_v2 }
  0x7d   :  { %3505 = vmatprep.subr.bf16.mxu1 %v3504_v40  ;;  %v360_v5 = vld [vmem:[#allocation8 + $0x2e8] sm:$0xff]  ;;  %v355_v11 = vld [vmem:[#allocation8 + $0x2c0] sm:$0xff]  ;;  %v3454_v20 = vpack.c.bf16 %v156_v10, %v154_v7  ;;  %v4027_v7 = vld [vmem:[#allocation5 + $0x10] sm:$0xff] }
  0x7e   :  { %3443 = vmatpush1.bf16.msra.mxu0 %v3442_v46  ;;  %v359_v12 = vld [vmem:[#allocation8 + $0x2e0] sm:$0xff]  ;;  %v3516_v13 = vpack.c.bf16 %v360_v5, %v356_v4  ;;  %v159_v14 = vld [vmem:[#allocation7 + $0x188] sm:$0xff]  ;;  %v105_v4 = vld [vmem:[#allocation2 + $0x18] sm:$0xff] }
  0x7f   :  { %3445 = vmatprep.subr.bf16.mxu0 %v3444_v48  ;;  %v103_v16 = vld [vmem:[#allocation2 + $0x8] sm:$0xff]  ;;  %v3518_v21 = vpack.c.bf16 %v359_v12, %v355_v11  ;;  %v3456_v22 = vpack.c.bf16 %v161_v15, %v159_v14  ;;  %v158_v23 = vld [vmem:[#allocation7 + $0x180] sm:$0xff]  ;;  %v168_v48 = vld [vmem:[#allocation7 + $0x1d0] sm:$0xff] }
  0x80   :  { %3507 = vmatpush1.bf16.msra.mxu1 %v3506_v47  ;;  %v364_v17 = vld [vmem:[#allocation8 + $0x308] sm:$0xff]  ;;  %250 = vmatprep.mubr.f32.mxu0 %v103_v16  ;;  %v363_v25 = vld [vmem:[#allocation8 + $0x300] sm:$0xff]  ;;  %v3458_v32 = vpack.c.bf16 %v160_v24, %v158_v23  ;;  %v4023_v5 = vld [vmem:[#allocation5 + $0x18] sm:$0xff] }
  0x81   :  { %3509 = vmatprep.subr.bf16.mxu1 %v3508_v52  ;;  %v368_v18 = vld [vmem:[#allocation8 + $0x328] sm:$0xff]  ;;  %v367_v27 = vld [vmem:[#allocation8 + $0x320] sm:$0xff] }
  0x82   :  { %3447 = vmatpush1.bf16.msra.mxu0 %v3446_v58  ;;  %v4018_v19 = vld [vmem:[#allocation5 + $0x8] sm:$0xff]  ;;  %v3520_v26 = vpack.c.bf16 %v368_v18, %v364_v17  ;;  %v3522_v33 = vpack.c.bf16 %v367_v27, %v363_v25  ;;  %v162_v35 = vld [vmem:[#allocation7 + $0x1a0] sm:$0xff] }
  0x83   :  { %3449 = vmatprep.subr.bf16.mxu0 %v3448_v60  ;;  %481 = vmatprep.mubr.f32.mxu1 %v4018_v19  ;;  %v163_v28 = vld [vmem:[#allocation7 + $0x1a8] sm:$0xff]  ;;  %v371_v37 = vld [vmem:[#allocation8 + $0x340] sm:$0xff]  ;;  %v3462_v44 = vpack.c.bf16 %v164_v36, %v162_v35  ;;  %v172_v60 = vld [vmem:[#allocation7 + $0x1f0] sm:$0xff] }
  0x84   :  { %3511 = vmatpush1.bf16.msra.mxu1 %v3510_v59  ;;  %v372_v30 = vld [vmem:[#allocation8 + $0x348] sm:$0xff]  ;;  %v3460_v34 = vpack.c.bf16 %v165_v29, %v163_v28  ;;  %v375_v39 = vld [vmem:[#allocation8 + $0x360] sm:$0xff] }
  0x85   :  { %3513 = vmatprep.subr.bf16.mxu1 %v3512_v0  ;;  %v376_v31 = vld [vmem:[#allocation8 + $0x368] sm:$0xff]  ;;  %v3526_v45 = vpack.c.bf16 %v375_v39, %v371_v37  ;;  %v166_v47 = vld [vmem:[#allocation7 + $0x1c0] sm:$0xff] }
  0x86   :  { %3451 = vmatpush1.bf16.msra.mxu0 %v3450_v6  ;;  %v3524_v38 = vpack.c.bf16 %v376_v31, %v372_v30  ;;  %v167_v40 = vld [vmem:[#allocation7 + $0x1c8] sm:$0xff]  ;;  %v379_v49 = vld [vmem:[#allocation8 + $0x380] sm:$0xff]  ;;  %v3466_v56 = vpack.c.bf16 %v168_v48, %v166_v47  ;;  %v104_v6 = vld [vmem:[#allocation2 + $0x10] sm:$0xff] }
  0x87   :  { %3453 = vmatprep.subr.bf16.mxu0 %v3452_v9  ;;  %v380_v42 = vld [vmem:[#allocation8 + $0x388] sm:$0xff]  ;;  %v3464_v46 = vpack.c.bf16 %v169_v41, %v167_v40  ;;  %v383_v51 = vld [vmem:[#allocation8 + $0x3a0] sm:$0xff]  ;;  %v274_v47 = vld [vmem:[#allocation8 + $0x38] sm:$0xff] }
  0x88   :  { %3515 = vmatpush1.bf16.msra.mxu1 %v3514_v8  ;;  %v384_v43 = vld [vmem:[#allocation8 + $0x3a8] sm:$0xff]  ;;  %v3530_v57 = vpack.c.bf16 %v383_v51, %v379_v49  ;;  %v170_v59 = vld [vmem:[#allocation7 + $0x1e0] sm:$0xff]  ;;  %v176_v8 = vlaneseq  ;;  %v269_v49 = vld [vmem:[#allocation8 + $0x10] sm:$0xff] }
  0x89   :  { %3517 = vmatprep.subr.bf16.mxu1 %v3516_v13  ;;  %v3528_v50 = vpack.c.bf16 %v384_v43, %v380_v42  ;;  %v171_v52 = vld [vmem:[#allocation7 + $0x1e8] sm:$0xff]  ;;  %v387_v62 = vld [vmem:[#allocation8 + $0x3c0] sm:$0xff]  ;;  %v3470_v0 = vpack.c.bf16 %v172_v60, %v170_v59  ;;  %v286_v59 = vld [vmem:[#allocation8 + $0x98] sm:$0xff] }
  0x8a   :  { %3455 = vmatpush1.bf16.msra.mxu0 %v3454_v20  ;;  %v388_v54 = vld [vmem:[#allocation8 + $0x3c8] sm:$0xff]  ;;  %v3468_v58 = vpack.c.bf16 %v173_v53, %v171_v52  ;;  %v391_v63 = vld [vmem:[#allocation8 + $0x3e0] sm:$0xff]  ;;  %v4032_v9 = vshrl.u32 %v176_v8, 7  ;;  %v278_v52 = vld [vmem:[#allocation8 + $0x58] sm:$0xff] }
  0x8b   :  { %3457 = vmatprep.subr.bf16.mxu0 %v3456_v22  ;;  %v392_v55 = vld [vmem:[#allocation8 + $0x3e8] sm:$0xff]  ;;  %v3534_v1 = vpack.c.bf16 %v391_v63, %v387_v62  ;;  %v102_v2 = vld [vmem:[#allocation2] sm:$0xff]  ;;  %v282_v53 = vld [vmem:[#allocation8 + $0x78] sm:$0xff] }
  0x8c   :  { %3519 = vmatpush1.bf16.msra.mxu1 %v3518_v21  ;;  %v3532_v61 = vpack.c.bf16 %v392_v55, %v388_v54  ;;  %v4021_v3 = vld [vmem:[#allocation5] sm:$0xff]  ;;  %v4035_v10 = vsub.s32 0, %v4032_v9  ;;  %v4041_v12 = vsub.s32 1, %v4032_v9  ;;  %v3875_v54 = vmov 0.0   ;;  %v290_v60 = vld [vmem:[#allocation8 + $0xb8] sm:$0xff]  ;;  %v289_v63 = vld [vmem:[#allocation8 + $0xb0] sm:$0xff] }
  0x8d   :  { %3521 = vmatprep.subr.bf16.mxu1 %v3520_v26  ;;  %v174_v11 = vld [vmem:[%s4556_s4] sm:$0x3]  ;;  %s3874_s4 = smov 64   ;;  %v3540_v55 = vpack.c.bf16 %v282_v53, %v278_v52  ;;  %v3544_v62 = vpack.c.bf16 %v290_v60, %v286_v59  ;;  %v329_v53 = vld [vmem:[#allocation8 + $0x1f0] sm:$0xff] }
  0x8e   :  { %3459 = vmatpush1.bf16.msra.mxu0 %v3458_v32  ;;  %v4046_v13 = vld [vmem:[%s4558_s6] sm:$0xf]  ;;  %v179_v14 = vrot.slane %v174_v11, %v4035_v10  ;;  %v183_v16 = vrot.slane %v174_v11, %v4041_v12  ;;  %v297_v11 = vld [vmem:[#allocation8 + $0xf0] sm:$0xff] }
  0x8f   :  { %3461 = vmatprep.subr.bf16.mxu0 %v3460_v34  ;;  %v400_v15 = vrot.slane %v4046_v13, %v4035_v10  ;;  %v404_v17 = vrot.slane %v4046_v13, %v4041_v12  ;;  %v337_v60 = vld [vmem:[#allocation8 + $0x230] sm:$0xff] }
  0x90   :  { %3523 = vmatpush1.bf16.msra.mxu1 %v3522_v33 }
  0x91   :  { %3525 = vmatprep.subr.bf16.mxu1 %v3524_v38 }
  0x92   :  { %3463 = vmatpush1.bf16.msra.mxu0 %v3462_v44 }
  0x93   :  { %3465 = vmatprep.subr.bf16.mxu0 %v3464_v46  ;;  %v270_v46 = vld [vmem:[#allocation8 + $0x18] sm:$0xff] }
  0x94   :  { %3527 = vmatpush1.bf16.msra.mxu1 %v3526_v45  ;;  %v3536_v48 = vpack.c.bf16 %v274_v47, %v270_v46  ;;  %v321_v47 = vld [vmem:[#allocation8 + $0x1b0] sm:$0xff] }
  0x95   :  { %3529 = vmatprep.subr.bf16.mxu1 %v3528_v50  ;;  %v273_v50 = vld [vmem:[#allocation8 + $0x30] sm:$0xff] }
  0x96   :  { %3467 = vmatpush1.bf16.msra.mxu0 %v3466_v56  ;;  %v3538_v51 = vpack.c.bf16 %v273_v50, %v269_v49  ;;  %v277_v56 = vld [vmem:[#allocation8 + $0x50] sm:$0xff]  ;;  %v326_v49 = vld [vmem:[#allocation8 + $0x1d8] sm:$0xff] }
  0x97   :  { %3469 = vmatprep.subr.bf16.mxu0 %v3468_v58  ;;  %v330_v50 = vld [vmem:[#allocation8 + $0x1f8] sm:$0xff] }
  0x98   :  { %3531 = vmatpush1.bf16.msra.mxu1 %v3530_v57  ;;  %v281_v57 = vld [vmem:[#allocation8 + $0x70] sm:$0xff]  ;;  %v3564_v52 = vpack.c.bf16 %v330_v50, %v326_v49 }
  0x99   :  { %3533 = vmatprep.subr.bf16.mxu1 %v3532_v61  ;;  %v3542_v58 = vpack.c.bf16 %v281_v57, %v277_v56  ;;  %v285_v61 = vld [vmem:[#allocation8 + $0x90] sm:$0xff]  ;;  %v334_v56 = vld [vmem:[#allocation8 + $0x218] sm:$0xff] }
  0x9a   :  { %3471 = vmatpush1.bf16.msra.mxu0 %v3470_v0  ;;  %v3546_v0 = vpack.c.bf16 %v289_v63, %v285_v61  ;;  %v338_v57 = vld [vmem:[#allocation8 + $0x238] sm:$0xff]  ;;  %v365_v49 = vld [vmem:[#allocation8 + $0x310] sm:$0xff] }
  0x9b   :  { %3537 = vmatprep.subr.bf16.mxu0 %v3536_v48  ;;  %v3568_v59 = vpack.c.bf16 %v338_v57, %v334_v56  ;;  %v346_v63 = vld [vmem:[#allocation8 + $0x278] sm:$0xff]  ;;  %v369_v50 = vld [vmem:[#allocation8 + $0x330] sm:$0xff] }
  0x9c   :  { %3535 = vmatpush1.bf16.msra.mxu1 %v3534_v1  ;;  %v294_v1 = vld [vmem:[#allocation8 + $0xd8] sm:$0xff] }
  0x9d   :  { %251 = vmatmul.mubr.f32.vlgmr.msra.gmra.mrb[0].mxu0 %v102_v2  ;;  %3328 = vmatprep.subr.mxu1 %v3875_v54  ;;  %v298_v2 = vld [vmem:[#allocation8 + $0xf8] sm:$0xff] }
  0x9e   :  { %256 = vmatprep.mubr.f32.mxu0 %v105_v4  ;;  %3539 = vmatpush1.bf16.msra.mxu0 %v3538_v51  ;;  %v293_v4 = vld [vmem:[#allocation8 + $0xd0] sm:$0xff] }
  0x9f   :  { %482 = vmatmul.mubr.f32.vlgmr.msra.gmra.mrb[0].mxu1 %v4021_v3  ;;  %3541 = vmatprep.subr.bf16.mxu0 %v3540_v55  ;;  %v325_v51 = vld [vmem:[#allocation8 + $0x1d0] sm:$0xff] }
  0xa0   :  { %487 = vmatprep.mubr.f32.mxu1 %v4023_v5  ;;  %v3566_v55 = vpack.c.bf16 %v329_v53, %v325_v51  ;;  %v374_v53 = vld [vmem:[#allocation8 + $0x358] sm:$0xff] }
  0xa1   :  { %257 = vmatmul.mubr.f32.gmra.mrb[2].mxu0 %v104_v6  ;;  %v3548_v6 = vpack.c.bf16 %v298_v2, %v294_v1  ;;  %v345_v2 = vld [vmem:[#allocation8 + $0x270] sm:$0xff] }
  0xa2   :  { %558 = vmatprep.mubr.f32.mxu0 %v4018_v19  ;;  %3543 = vmatpush1.bf16.msra.mxu0 %v3542_v58  ;;  %v333_v58 = vld [vmem:[#allocation8 + $0x210] sm:$0xff] }
  0xa3   :  { %488 = vmatmul.mubr.f32.gmra.mrb[2].mxu1 %v4027_v7  ;;  %3545 = vmatprep.subr.bf16.mxu0 %v3544_v62  ;;  %v3570_v61 = vpack.c.bf16 %v337_v60, %v333_v58  ;;  %v342_v62 = vld [vmem:[#allocation8 + $0x258] sm:$0xff]  ;;  %v3586_v58 = vpack.c.bf16 %v369_v50, %v365_v49  ;;  %v373_v60 = vld [vmem:[#allocation8 + $0x350] sm:$0xff] }
  0xa4   :  { %3330 = vmatprep.mubr.msk.f32.mxu1 %vm3876_vm0, %v3875_v54  ;;  %v3572_v1 = vpack.c.bf16 %v346_v63, %v342_v62  ;;  %v382_v63 = vld [vmem:[#allocation8 + $0x398] sm:$0xff] }
  0xa6   :  { %3547 = vmatpush1.bf16.msra.mxu0 %v3546_v0  ;;  %v341_v0 = vld [vmem:[#allocation8 + $0x250] sm:$0xff] }
  0xa7   :  { %3549 = vmatprep.subr.bf16.mxu0 %v3548_v6  ;;  %v354_v6 = vld [vmem:[#allocation8 + $0x2b8] sm:$0xff] }
 0x170   :  { %v252_v18 = vpop.f32.mrb[0].mxu0 }
 0x171   :  { %v253_v19 = vadd.f32 %v252_v18, %v179_v14  ;;  %v254_v21 = vpop.f32.mrb[1].mxu0 }
 0x172   :  { %v483_v20 = vpop.f32.mrb[0].mxu1  ;;  %v255_v24 = vadd.f32 %v254_v21, %v183_v16  ;;  %v310_v21 = vld [vmem:[#allocation8 + $0x158] sm:$0xff] }
 0x173   :  { %v4054_v22 = vadd.f32 %v483_v20, %v400_v15  ;;  %v485_v23 = vpop.f32.mrb[1].mxu1  ;;  %v4056_v25 = vmul.f32 0.125, %v253_v19  ;;  %v305_v19 = vld [vmem:[#allocation8 + $0x130] sm:$0xff] }
 0x174   :  { %v4058_v26 = vadd.f32 %v485_v23, %v404_v17  ;;  %v4062_v27 = vmul.f32 0.125, %v255_v24  ;;  %v258_v28 = vpop.f32.mrb[2].mxu0  ;;  %v314_v23 = vld [vmem:[#allocation8 + $0x178] sm:$0xff]  ;;  %v309_v24 = vld [vmem:[#allocation8 + $0x150] sm:$0xff] }
 0x175   :  { %861 = vrot.lane.b32.xlu0 %v4054_v22, %s3874_s4  ;;  %573 = vrot.lane.b32.xlu1 %v4056_v25, %s3874_s4  ;;  %v259_v32 = vadd.f32 %v258_v28, %v179_v14  ;;  %v260_v33 = vpop.f32.mrb[3].mxu0  ;;  %v3550_v14 = vpack.c.bf16 %v297_v11, %v293_v4  ;;  %v3556_v28 = vpack.c.bf16 %v314_v23, %v310_v21  ;;  %v350_v4 = vld [vmem:[#allocation8 + $0x298] sm:$0xff]  ;;  %v3877_v11 = vmov 0  }
 0x176   :  { %v875_v29 = vcombine.low %v4054_v22, %v4058_v26  ;;  %v876_v30 = vcombine.high %v4054_v22, %v4058_v26  ;;  %v489_v31 = vpop.f32.mrb[2].mxu1  ;;  %v587_v34 = vcombine.low %v4056_v25, %v4062_v27  ;;  %v588_v35 = vcombine.high %v4056_v25, %v4062_v27  ;;  %3681 = vset.pattern.permute.xlu0 %v3877_v11  ;;  %v362_v21 = vld [vmem:[#allocation8 + $0x2f8] sm:$0xff] }
 0x177   :  { %v491_v36 = vpop.f32.mrb[3].mxu1  ;;  %v261_v37 = vadd.f32 %v260_v33, %v183_v16  ;;  %v4074_v38 = vadd.f32 %v489_v31, %v400_v15  ;;  %v4080_v40 = vmul.f32 0.125, %v259_v32  ;;  %3551 = vmatpush1.bf16.msra.mxu0 %v3550_v14  ;;  %v302_v15 = vld [vmem:[#allocation8 + $0x118] sm:$0xff]  ;;  %v313_v31 = vld [vmem:[#allocation8 + $0x170] sm:$0xff]  ;;  %v3878_v14 = vmov 1966171168   ;;  %3682 = vset.pattern.permute.xlu1 %v3877_v11 }
 0x178   :  { %v4076_v39 = vadd.f32 %v491_v36, %v404_v17  ;;  %v306_v16 = vld [vmem:[#allocation8 + $0x138] sm:$0xff]  ;;  %v301_v17 = vld [vmem:[#allocation8 + $0x110] sm:$0xff]  ;;  %v3558_v32 = vpack.c.bf16 %v313_v31, %v309_v24 }
 0x179   :  { %869 = vrot.lane.b32.xlu0 %v4058_v26, %s3874_s4  ;;  %v4082_v41 = vmul.f32 0.125, %v261_v37  ;;  %581 = vrot.lane.b32.xlu1 %v4062_v27, %s3874_s4  ;;  %v3552_v18 = vpack.c.bf16 %v306_v16, %v302_v15  ;;  %v3554_v20 = vpack.c.bf16 %v305_v19, %v301_v17  ;;  %v318_v33 = vld [vmem:[#allocation8 + $0x198] sm:$0xff]  ;;  %v317_v37 = vld [vmem:[#allocation8 + $0x190] sm:$0xff]  ;;  %v1448_v15 = vunpack.c.l.s4 %v3878_v14 }
 0x17a   :  { %v943_v42 = vcombine.low %v4074_v38, %v4076_v39  ;;  %v944_v43 = vcombine.high %v4074_v38, %v4076_v39  ;;  %v322_v36 = vld [vmem:[#allocation8 + $0x1b8] sm:$0xff]  ;;  %v3562_v48 = vpack.c.bf16 %v321_v47, %v317_v37  ;;  %v3574_v16 = vpack.c.bf16 %v345_v2, %v341_v0  ;;  %v353_v19 = vld [vmem:[#allocation8 + $0x2b0] sm:$0xff]  ;;  %v3267_v47 = vld.sshfl [vmem:[%s4554_s2] sm:$0x11 pattern:$0x75316420] }
 0x17b   :  { %v655_v44 = vcombine.low %v4080_v40, %v4082_v41  ;;  %v656_v45 = vcombine.high %v4080_v40, %v4082_v41  ;;  %3553 = vmatprep.subr.bf16.mxu0 %v3552_v18  ;;  %v3560_v46 = vpack.c.bf16 %v322_v36, %v318_v33  ;;  %v3576_v17 = vpack.c.bf16 %v354_v6, %v350_v4  ;;  %v349_v18 = vld [vmem:[#allocation8 + $0x290] sm:$0xff]  ;;  %v366_v36 = vld [vmem:[#allocation8 + $0x318] sm:$0xff] }
 0x17c   :  { %3555 = vmatpush1.bf16.msra.mxu0 %v3554_v20  ;;  %v358_v20 = vld [vmem:[#allocation8 + $0x2d8] sm:$0xff]  ;;  %v1449_v23 = vunpack.c.0.s8 %v1448_v15  ;;  %v3578_v24 = vpack.c.bf16 %v353_v19, %v349_v18  ;;  %v357_v31 = vld [vmem:[#allocation8 + $0x2d0] sm:$0xff] }
 0x17d   :  { %863 = vrot.lane.b32.xlu0 %v4074_v38, %s3874_s4  ;;  %871 = vrot.lane.b32.xlu1 %v4076_v39, %s3874_s4  ;;  %v370_v37 = vld [vmem:[#allocation8 + $0x338] sm:$0xff]  ;;  %v381_v4 = vld [vmem:[#allocation8 + $0x390] sm:$0xff] }
 0x17e   :  { %3557 = vmatprep.subr.bf16.mxu0 %v3556_v28  ;;  %v3580_v28 = vpack.c.bf16 %v362_v21, %v358_v20  ;;  %v1452_v33 = vsub.s32 %v1449_v23, %v4032_v9  ;;  %v386_v0 = vld [vmem:[#allocation8 + $0x3b8] sm:$0xff]  ;;  %v385_v6 = vld [vmem:[#allocation8 + $0x3b0] sm:$0xff]  ;;  %v3879_v20 = vmov 1983009808   ;;  %v3880_v23 = vmov 1934713408  }
 0x17f   :  { %v3592_v2 = vpack.c.bf16 %v386_v0, %v382_v63  ;;  %v390_v11 = vld [vmem:[#allocation8 + $0x3d8] sm:$0xff]  ;;  %v3594_v15 = vpack.c.bf16 %v385_v6, %v381_v4  ;;  %v393_v18 = vld [vmem:[#allocation8 + $0x3f0] sm:$0xff]  ;;  %v590_v21 = vunpack.c.l.s4 %v3879_v20 }
 0x180   :  { %3559 = vmatpush1.bf16.msra.mxu0 %v3558_v32  ;;  %v361_v32 = vld [vmem:[#allocation8 + $0x2f0] sm:$0xff]  ;;  %v1453_v51 = vrot.slane %v3267_v47, %v1452_v33  ;;  %v394_v14 = vld [vmem:[#allocation8 + $0x3f8] sm:$0xff] }
 0x181   :  { %575 = vrot.lane.b32.xlu0 %v4080_v40, %s3874_s4  ;;  %583 = vrot.lane.b32.xlu1 %v4082_v41, %s3874_s4 }
 0x182   :  { %3561 = vmatprep.subr.bf16.mxu0 %v3560_v46  ;;  %v3582_v46 = vpack.c.bf16 %v361_v32, %v357_v31  ;;  %v1464_v56 = vrot.slane %v1453_v51, %v4035_v10 }
 0x184   :  { %3563 = vmatpush1.bf16.msra.mxu0 %v3562_v48  ;;  %v3584_v48 = vpack.c.bf16 %v370_v37, %v366_v36 }
 0x185   :  { %3565 = vmatprep.subr.bf16.mxu0 %v3564_v52  ;;  %v1446_v52 = vcombine.high %v3267_v47, %v3267_v47  ;;  %1470 = vperm.xlu0 %3681, %v1464_v56  }
 0x187   :  { %v1460_v57 = vrot.slane %v1446_v52, %v1452_v33 }
 0x188   :  { %3567 = vmatpush1.bf16.msra.mxu0 %v3566_v55  ;;  %v378_v55 = vld [vmem:[#allocation8 + $0x378] sm:$0xff] }
 0x189   :  { %3569 = vmatprep.subr.bf16.mxu0 %v3568_v59  ;;  %v3588_v59 = vpack.c.bf16 %v378_v55, %v374_v53  ;;  %v1468_v62 = vrot.slane %v1460_v57, %v4035_v10 }
 0x18b   :  { %1473 = vperm.xlu1 %3682, %v1468_v62  }
 0x18c   :  { %3571 = vmatpush1.bf16.msra.mxu0 %v3570_v61  ;;  %v377_v61 = vld [vmem:[#allocation8 + $0x370] sm:$0xff] }
 0x18d   :  { %3573 = vmatprep.subr.bf16.mxu0 %v3572_v1  ;;  %v3590_v1 = vpack.c.bf16 %v377_v61, %v373_v60 }
 0x190   :  { %3575 = vmatpush1.bf16.msra.mxu0 %v3574_v16  ;;  %v3596_v16 = vpack.c.bf16 %v394_v14, %v390_v11 }
 0x191   :  { %3577 = vmatprep.subr.bf16.mxu0 %v3576_v17  ;;  %v389_v17 = vld [vmem:[#allocation8 + $0x3d0] sm:$0xff] }
 0x192   :  { %v3598_v19 = vpack.c.bf16 %v393_v18, %v389_v17 }
 0x194   :  { %3579 = vmatpush1.bf16.msra.mxu0 %v3578_v24  ;;  %v622_v24 = vunpack.c.l.s4 %v3880_v23 }
 0x195   :  { %3581 = vmatprep.subr.bf16.mxu0 %v3580_v28  ;;  %v591_v28 = vunpack.c.0.s8 %v590_v21 }
 0x196   :  { %v623_v31 = vunpack.c.0.s8 %v622_v24 }
 0x197   :  { %v4115_v33 = vsub.s32 %v591_v28, %v4032_v9 }
 0x198   :  { %3583 = vmatpush1.bf16.msra.mxu0 %v3582_v46  ;;  %v4118_v37 = vsub.s32 %v623_v31, %v4032_v9 }
 0x199   :  { %3585 = vmatprep.subr.bf16.mxu0 %v3584_v48  ;;  %v595_v49 = vrot.slane %v587_v34, %v4115_v33  ;;  %v602_v50 = vrot.slane %v588_v35, %v4115_v33  ;;  %v4140_v22 = vrot.slane %v943_v42, %v4115_v33  ;;  %v4146_v26 = vrot.slane %v944_v43, %v4115_v33 }
 0x19a   :  { %v4154_v25 = vrot.slane %v655_v44, %v4115_v33  ;;  %v4160_v27 = vrot.slane %v656_v45, %v4115_v33 }
 0x19c   :  { %3587 = vmatpush1.bf16.msra.mxu0 %v3586_v58 }
 0x19d   :  { %3589 = vmatprep.subr.bf16.mxu0 %v3588_v59 }
 0x1a0   :  { %3591 = vmatpush1.bf16.msra.mxu0 %v3590_v1 }
 0x1a1   :  { %3593 = vmatprep.subr.bf16.mxu0 %v3592_v2 }
 0x1a4   :  { %3595 = vmatpush1.bf16.msra.mxu0 %v3594_v15 }
 0x1a5   :  { %3597 = vmatprep.subr.bf16.mxu0 %v3596_v16 }
 0x1a8   :  { %3599 = vmatpush1.bf16.msra.mxu0 %v3598_v19 }
 0x1ab   :  { %559 = vmatmul.mubr.f32.vlgmr.msra.gmra.mrb[4].mxu0 %v4021_v3  ;;  %v883_v3 = vrot.slane %v875_v29, %v4115_v33 }
 0x1ac   :  { %564 = vmatprep.mubr.f32.mxu0 %v4023_v5  ;;  %v890_v5 = vrot.slane %v876_v30, %v4115_v33 }
 0x1af   :  { %565 = vmatmul.mubr.f32.gmra.mrb[6].mxu0 %v4027_v7 }
 0x1e7   :  { %v862_v32 = vpop.permute.xlu0 %861  ;;  %v574_v36 = vpop.permute.xlu1 %573 }
 0x1eb   :  { %v870_v46 = vpop.permute.xlu0 %869  ;;  %v582_v48 = vpop.permute.xlu1 %581 }
 0x1ec   :  { %v891_v7 = vcombine.low %v862_v32, %v870_v46  ;;  %v892_v47 = vcombine.high %v862_v32, %v870_v46  ;;  %v603_v51 = vcombine.low %v574_v36, %v582_v48  ;;  %v604_v29 = vcombine.high %v574_v36, %v582_v48 }
 0x1ee   :  { %v899_v30 = vrot.slane %v891_v7, %v4115_v33  ;;  %v906_v34 = vrot.slane %v892_v47, %v4115_v33  ;;  %v611_v35 = vrot.slane %v603_v51, %v4115_v33  ;;  %v618_v38 = vrot.slane %v604_v29, %v4115_v33 }
 0x1ef   :  { %v864_v44 = vpop.permute.xlu0 %863  ;;  %v872_v58 = vpop.permute.xlu1 %871 }
 0x1f0   :  { %v907_v39 = vcombine.low %v883_v3, %v899_v30  ;;  %v908_v42 = vcombine.high %v883_v3, %v899_v30  ;;  %v923_v43 = vcombine.low %v890_v5, %v906_v34  ;;  %v924_v52 = vcombine.high %v890_v5, %v906_v34 }
 0x1f1   :  { %v619_v53 = vcombine.low %v595_v49, %v611_v35  ;;  %v620_v55 = vcombine.high %v595_v49, %v611_v35  ;;  %v635_v56 = vcombine.low %v602_v50, %v618_v38  ;;  %v636_v57 = vcombine.high %v602_v50, %v618_v38 }
 0x1f2   :  { %v915_v59 = vrot.slane %v907_v39, %v4118_v37  ;;  %v922_v40 = vrot.slane %v908_v42, %v4118_v37  ;;  %v931_v41 = vrot.slane %v923_v43, %v4118_v37  ;;  %v938_v45 = vrot.slane %v924_v52, %v4118_v37 }
 0x1f3   :  { %v627_v60 = vrot.slane %v619_v53, %v4118_v37  ;;  %v634_v61 = vrot.slane %v620_v55, %v4118_v37  ;;  %v643_v62 = vrot.slane %v635_v56, %v4118_v37  ;;  %v650_v63 = vrot.slane %v636_v57, %v4118_v37  ;;  %v576_v28 = vpop.permute.xlu0 %575  ;;  %v584_v31 = vpop.permute.xlu1 %583 }
 0x1f4   :  { %v1011_v0 = vcombine.low %v915_v59, %v922_v40  ;;  %v3259_v1 = vcombine.high %v915_v59, %v922_v40  ;;  %v1027_v2 = vcombine.low %v931_v41, %v938_v45  ;;  %v3260_v4 = vcombine.high %v931_v41, %v938_v45 }
 0x1f5   :  { %v723_v6 = vcombine.low %v627_v60, %v634_v61  ;;  %v3255_v11 = vcombine.high %v627_v60, %v634_v61  ;;  %v739_v14 = vcombine.low %v643_v62, %v650_v63  ;;  %v3256_v15 = vcombine.high %v643_v62, %v650_v63 }
 0x1f6   :  { %v4173_v16 = vrot.slane %v1011_v0, %v4115_v33  ;;  %v4176_v17 = vrot.slane %v3259_v1, %v4115_v33  ;;  %v4179_v18 = vrot.slane %v1027_v2, %v4115_v33  ;;  %v4182_v19 = vrot.slane %v3260_v4, %v4115_v33 }
 0x1f7   :  { %v4185_v20 = vrot.slane %v723_v6, %v4115_v33  ;;  %v4188_v21 = vrot.slane %v3255_v11, %v4115_v33  ;;  %v4191_v23 = vrot.slane %v739_v14, %v4115_v33  ;;  %v4194_v24 = vrot.slane %v3256_v15, %v4115_v33 }
 0x1f8   :  { %v1043_v32 = vcombine.low %v4173_v16, %v4176_v17  ;;  %v1044_v36 = vcombine.high %v4173_v16, %v4176_v17  ;;  %v1059_v46 = vcombine.low %v4179_v18, %v4182_v19  ;;  %v1060_v3 = vcombine.high %v4179_v18, %v4182_v19 }
 0x1f9   :  { %v755_v5 = vcombine.low %v4185_v20, %v4188_v21  ;;  %v756_v7 = vcombine.high %v4185_v20, %v4188_v21  ;;  %v771_v47 = vcombine.low %v4191_v23, %v4194_v24  ;;  %v772_v48 = vcombine.high %v4191_v23, %v4194_v24 }
 0x1fa   :  { %v959_v49 = vcombine.low %v864_v44, %v872_v58  ;;  %v960_v50 = vcombine.high %v864_v44, %v872_v58  ;;  %v671_v51 = vcombine.low %v576_v28, %v584_v31  ;;  %v672_v29 = vcombine.high %v576_v28, %v584_v31 }
 0x1fb   :  { %v763_v30 = vrot.slane %v755_v5, %v4118_v37  ;;  %v779_v34 = vrot.slane %v771_v47, %v4118_v37  ;;  %v1051_v35 = vrot.slane %v1043_v32, %v4118_v37  ;;  %v1067_v38 = vrot.slane %v1059_v46, %v4118_v37 }
 0x1fc   :  { %v967_v39 = vrot.slane %v959_v49, %v4115_v33  ;;  %v974_v42 = vrot.slane %v960_v50, %v4115_v33  ;;  %v679_v43 = vrot.slane %v671_v51, %v4115_v33  ;;  %v686_v52 = vrot.slane %v672_v29, %v4115_v33 }
 0x1fd   :  { %v1075_v53 = vcombine.low %v1051_v35, %v1067_v38  ;;  %v787_v55 = vcombine.low %v763_v30, %v779_v34  ;;  %v1076_v56 = vcombine.high %v1051_v35, %v1067_v38  ;;  %v788_v57 = vcombine.high %v763_v30, %v779_v34 }
 0x1fe   :  { %v975_v44 = vcombine.low %v4140_v22, %v967_v39  ;;  %v976_v58 = vcombine.high %v4140_v22, %v967_v39  ;;  %v991_v59 = vcombine.low %v4146_v26, %v974_v42  ;;  %v992_v40 = vcombine.high %v4146_v26, %v974_v42 }
 0x1ff   :  { %v687_v41 = vcombine.low %v4154_v25, %v679_v43  ;;  %v688_v45 = vcombine.high %v4154_v25, %v679_v43  ;;  %v703_v60 = vcombine.low %v4160_v27, %v686_v52  ;;  %v704_v61 = vcombine.high %v4160_v27, %v686_v52  ;;  %3329 = vmatpush3.xpose.msk.msra.mxu1 %vm1481_vm1, %v1075_v53 }
 0x200   :  { %v983_v62 = vrot.slane %v975_v44, %v4118_v37  ;;  %v990_v63 = vrot.slane %v976_v58, %v4118_v37  ;;  %v999_v22 = vrot.slane %v991_v59, %v4118_v37  ;;  %v1006_v0 = vrot.slane %v992_v40, %v4118_v37  ;;  %3333 = vmatprep.subr.mxu1 %v3875_v54 }
 0x201   :  { %v695_v26 = vrot.slane %v687_v41, %v4118_v37  ;;  %v702_v25 = vrot.slane %v688_v45, %v4118_v37  ;;  %v711_v1 = vrot.slane %v703_v60, %v4118_v37  ;;  %v718_v27 = vrot.slane %v704_v61, %v4118_v37 }
 0x202   :  { %v1079_v2 = vcombine.low %v983_v62, %v990_v63  ;;  %v3261_v4 = vcombine.high %v983_v62, %v990_v63  ;;  %v1095_v6 = vcombine.low %v999_v22, %v1006_v0  ;;  %v3262_v11 = vcombine.high %v999_v22, %v1006_v0  ;;  %3331 = vmatmul.mubr.msk.f32.vlgmr.msra.gmra.mrb[4].mxu1 %vm1481_vm1, %v787_v55 }
 0x203   :  { %v791_v14 = vcombine.low %v695_v26, %v702_v25  ;;  %v3257_v15 = vcombine.high %v695_v26, %v702_v25  ;;  %v807_v28 = vcombine.low %v711_v1, %v718_v27  ;;  %v3258_v31 = vcombine.high %v711_v1, %v718_v27  ;;  %3334 = vmatpush3.xpose.msk.msra.mxu1 %vm1481_vm1, %v1076_v56 }
 0x204   :  { %v1086_v32 = vrot.slane %v1079_v2, %v4115_v33  ;;  %v1094_v46 = vrot.slane %v3261_v4, %v4115_v33  ;;  %v1102_v5 = vrot.slane %v1095_v6, %v4115_v33  ;;  %v1110_v47 = vrot.slane %v3262_v11, %v4115_v33  ;;  %3335 = vmatprep.mubr.msk.f32.mxu1 %vm3876_vm0, %v3875_v54  ;;  %v1471_v0 = vpop.permute.xlu0 %1470 }
 0x205   :  { %v798_v49 = vrot.slane %v791_v14, %v4115_v33  ;;  %v806_v50 = vrot.slane %v3257_v15, %v4115_v33  ;;  %v814_v51 = vrot.slane %v807_v28, %v4115_v33  ;;  %v822_v29 = vrot.slane %v3258_v31, %v4115_v33  ;;  %3338 = vmatprep.subr.mxu1 %v3875_v54 }
 0x206   :  { %v1111_v30 = vcombine.low %v1086_v32, %v1094_v46  ;;  %v1112_v34 = vcombine.high %v1086_v32, %v1094_v46  ;;  %v1127_v35 = vcombine.low %v1102_v5, %v1110_v47  ;;  %v1128_v38 = vcombine.high %v1102_v5, %v1110_v47  ;;  %3336 = vmatmul.mubr.msk.f32.vlgmr.msra.gmra.mrb[6].mxu1 %vm1481_vm1, %v788_v57 }
 0x207   :  { %v823_v39 = vcombine.low %v798_v49, %v806_v50  ;;  %v824_v42 = vcombine.high %v798_v49, %v806_v50  ;;  %v839_v43 = vcombine.low %v814_v51, %v822_v29  ;;  %v840_v52 = vcombine.high %v814_v51, %v822_v29  ;;  %3340 = vmatprep.mubr.msk.f32.mxu1 %vm3876_vm0, %v3875_v54 }
 0x208   :  { %v1058_v53 = vrot.slane %v1044_v36, %v4118_v37  ;;  %v1074_v55 = vrot.slane %v1060_v3, %v4118_v37  ;;  %v770_v56 = vrot.slane %v756_v7, %v4118_v37  ;;  %v786_v57 = vrot.slane %v772_v48, %v4118_v37 }
 0x209   :  { %v1119_v44 = vrot.slane %v1111_v30, %v4118_v37  ;;  %v1135_v16 = vrot.slane %v1127_v35, %v4118_v37  ;;  %v831_v17 = vrot.slane %v823_v39, %v4118_v37  ;;  %v847_v36 = vrot.slane %v839_v43, %v4118_v37 }
 0x20a   :  { %v1077_v18 = vcombine.low %v1058_v53, %v1074_v55  ;;  %v789_v19 = vcombine.low %v770_v56, %v786_v57  ;;  %v1078_v3 = vcombine.high %v1058_v53, %v1074_v55  ;;  %v790_v58 = vcombine.high %v770_v56, %v786_v57  ;;  %v1474_v32 = vpop.permute.xlu1 %1473 }
 0x20b   :  { %v1143_v59 = vcombine.low %v1119_v44, %v1135_v16  ;;  %v855_v20 = vcombine.low %v831_v17, %v847_v36  ;;  %v1144_v21 = vcombine.high %v1119_v44, %v1135_v16  ;;  %v856_v7 = vcombine.high %v831_v17, %v847_v36 }
 0x20c   :  { %3339 = vmatpush3.xpose.msk.msra.mxu1 %vm1481_vm1, %v1077_v18  ;;  %v1126_v23 = vrot.slane %v1112_v34, %v4118_v37  ;;  %v1142_v24 = vrot.slane %v1128_v38, %v4118_v37  ;;  %v838_v48 = vrot.slane %v824_v42, %v4118_v37  ;;  %v854_v40 = vrot.slane %v840_v52, %v4118_v37 }
 0x20d   :  { %3343 = vmatprep.subr.mxu1 %v3875_v54  ;;  %v1438_v22 = vand.u32 127, %v176_v8  ;;  %v407_v17 = vsub.s32 2, %v4032_v9  ;;  %v411_v36 = vsub.s32 3, %v4032_v9 }
 0x20e   :  { %v1145_v41 = vcombine.low %v1126_v23, %v1142_v24  ;;  %v857_v45 = vcombine.low %v838_v48, %v854_v40  ;;  %v1146_v60 = vcombine.high %v1126_v23, %v1142_v24  ;;  %v858_v61 = vcombine.high %v838_v48, %v854_v40 }
 0x20f   :  { %3341 = vmatmul.mubr.msk.f32.vlgmr.msra.gmra.mrb[8].mxu1 %vm1481_vm1, %v789_v19  ;;  %vm4309_vm2 = vcmp.lt.s32.totalorder %v1438_v22, %v1471_v0  ;;  %vm4324_vm4 = vcmp.lt.s32.totalorder %v1438_v22, %v1474_v32  ;;  %v4347_v18 = vrot.slane %v4046_v13, %v407_v17  ;;  %v4350_v19 = vrot.slane %v4046_v13, %v411_v36 }
 0x210   :  { %3344 = vmatpush3.xpose.msk.msra.mxu1 %vm1481_vm1, %v1078_v3  ;;  %3345 = vmatprep.mubr.msk.f32.mxu1 %vm3876_vm0, %v3875_v54 }
 0x211   :  { %3348 = vmatprep.subr.mxu1 %v3875_v54 }
 0x213   :  { %3346 = vmatmul.mubr.msk.f32.vlgmr.msra.gmra.mrb[10].mxu1 %vm1481_vm1, %v790_v58 }
 0x214   :  { %3349 = vmatpush3.xpose.msk.msra.mxu1 %vm1481_vm1, %v1143_v59  ;;  %3350 = vmatprep.mubr.msk.f32.mxu1 %vm3876_vm0, %v3875_v54 }
 0x215   :  { %3353 = vmatprep.subr.mxu1 %v3875_v54 }
 0x217   :  { %3351 = vmatmul.mubr.msk.f32.vlgmr.msra.gmra.mrb[12].mxu1 %vm1481_vm1, %v855_v20 }
 0x218   :  { %3354 = vmatpush3.xpose.msk.msra.mxu1 %vm1481_vm1, %v1144_v21  ;;  %3355 = vmatprep.mubr.msk.f32.mxu1 %vm3876_vm0, %v3875_v54 }
 0x219   :  { %3358 = vmatprep.subr.mxu1 %v3875_v54 }
 0x21b   :  { %3356 = vmatmul.mubr.msk.f32.vlgmr.msra.gmra.mrb[14].mxu1 %vm1481_vm1, %v856_v7 }
 0x21c   :  { %3359 = vmatpush3.xpose.msk.msra.mxu1 %vm1481_vm1, %v1145_v41  ;;  %3360 = vmatprep.mubr.msk.f32.mxu1 %vm3876_vm0, %v3875_v54 }
 0x21d   :  { %3363 = vmatprep.subr.mxu1 %v3875_v54 }
 0x21f   :  { %3361 = vmatmul.mubr.msk.f32.vlgmr.msra.gmra.mrb[16].mxu1 %vm1481_vm1, %v857_v45 }
 0x220   :  { %3364 = vmatpush3.xpose.msk.msra.mxu1 %vm1481_vm1, %v1146_v60  ;;  %3365 = vmatprep.mubr.msk.f32.mxu1 %vm3876_vm0, %v3875_v54 }
 0x221   :  { %3368 = vmatprep.subr.mxu1 %v3875_v54 }
 0x223   :  { %3366 = vmatmul.mubr.msk.f32.vlgmr.msra.gmra.mrb[18].mxu1 %vm1481_vm1, %v858_v61 }
 0x224   :  { %3370 = vmatprep.mubr.msk.f32.mxu1 %vm3876_vm0, %v3875_v54 }
 0x27e   :  { %v560_v62 = vpop.f32.mrb[4].mxu0 }
 0x27f   :  { %v562_v63 = vpop.f32.mrb[5].mxu0  ;;  %v4353_v3 = vadd.f32 %v560_v62, %v4347_v18 }
 0x280   :  { %v4356_v58 = vadd.f32 %v562_v63, %v4350_v19 }
 0x282   :  { %v4362_v59 = vpop.f32.mrb[6].mxu0 }
 0x283   :  { %v4364_v9 = vpop.f32.mrb[7].mxu0 }
 0x2d5   :  { %v1554_v25 = vpop.f32.mrb[4].mxu1 }
 0x2d6   :  { %v2090_v1 = vsel %vm4309_vm2, %v1554_v25, -3.4028235e+38  ;;  %v3332_v27 = vpop.f32.mrb[5].mxu1 }
 0x2d7   :  { %v2099_v2 = vsel %vm2098_vm3, %v2090_v1, -inf }
 0x2d8   :  { %2100 = vmax.xlane.f32.xlu1 %v2099_v2 }
 0x2d9   :  { %v1630_v4 = vpop.f32.mrb[6].mxu1 }
 0x2da   :  { %v2091_v6 = vsel %vm4309_vm2, %v1630_v4, -3.4028235e+38  ;;  %v3337_v11 = vpop.f32.mrb[7].mxu1 }
 0x2db   :  { %v2102_v8 = vsel %vm2098_vm3, %v2091_v6, -inf }
 0x2dc   :  { %2103 = vmax.xlane.f32.xlu0 %v2102_v8 }
 0x2e2   :  { %v1706_v14 = vpop.f32.mrb[8].mxu1 }
 0x2e3   :  { %v2092_v15 = vsel %vm4309_vm2, %v1706_v14, -3.4028235e+38  ;;  %v3342_v28 = vpop.f32.mrb[9].mxu1 }
 0x2e4   :  { %v2105_v31 = vsel %vm2098_vm3, %v2092_v15, -inf }
 0x2e5   :  { %2106 = vmax.xlane.f32.xlu0 %v2105_v31 }
 0x2e6   :  { %v1782_v46 = vpop.f32.mrb[10].mxu1 }
 0x2e7   :  { %v2093_v5 = vsel %vm4309_vm2, %v1782_v46, -3.4028235e+38  ;;  %v3347_v47 = vpop.f32.mrb[11].mxu1 }
 0x2e8   :  { %v2108_v50 = vsel %vm2098_vm3, %v2093_v5, -inf }
 0x2e9   :  { %2109 = vmax.xlane.f32.xlu1 %v2108_v50 }
 0x2ea   :  { %v1858_v51 = vpop.f32.mrb[12].mxu1 }
 0x2eb   :  { %v2094_v29 = vsel %vm4324_vm4, %v1858_v51, -3.4028235e+38  ;;  %v3352_v30 = vpop.f32.mrb[13].mxu1 }
 0x2ec   :  { %v2111_v34 = vsel %vm2098_vm3, %v2094_v29, -inf }
 0x2ed   :  { %2112 = vmax.xlane.f32.xlu0 %v2111_v34  ;;  %v1163_v34 = vcombine.low %v4353_v3, %v4356_v58 }
 0x2ee   :  { %v1934_v35 = vpop.f32.mrb[14].mxu1 }
 0x2ef   :  { %v2095_v38 = vsel %vm4324_vm4, %v1934_v35, -3.4028235e+38  ;;  %v3357_v39 = vpop.f32.mrb[15].mxu1  ;;  %v1164_v35 = vcombine.high %v4353_v3, %v4356_v58 }
 0x2f0   :  { %v2114_v42 = vsel %vm2098_vm3, %v2095_v38, -inf }
 0x2f1   :  { %2115 = vmax.xlane.f32.xlu1 %v2114_v42 }
 0x2f2   :  { %v2010_v43 = vpop.f32.mrb[16].mxu1 }
 0x2f3   :  { %v2096_v52 = vsel %vm4324_vm4, %v2010_v43, -3.4028235e+38  ;;  %v3362_v53 = vpop.f32.mrb[17].mxu1 }
 0x2f4   :  { %v2117_v55 = vsel %vm2098_vm3, %v2096_v52, -inf  ;;  %v1171_v53 = vrot.slane %v1163_v34, %v4115_v33 }
 0x2f5   :  { %2118 = vmax.xlane.f32.xlu0 %v2117_v55  ;;  %v1178_v55 = vrot.slane %v1164_v35, %v4115_v33 }
 0x2f6   :  { %v2086_v56 = vpop.f32.mrb[18].mxu1 }
 0x2f7   :  { %v4340_v57 = vsel %vm4324_vm4, %v2086_v56, -3.4028235e+38  ;;  %v3367_v44 = vpop.f32.mrb[19].mxu1 }
 0x2f8   :  { %v2120_v16 = vsel %vm2098_vm3, %v4340_v57, -inf }
 0x2f9   :  { %2121 = vmax.xlane.f32.xlu1 %v2120_v16 }
 0x30a   :  { %1149 = vrot.lane.b32.xlu1 %v4353_v3, %s3874_s4 }
 0x30b   :  { %1157 = vrot.lane.b32.xlu0 %v4356_v58, %s3874_s4 }
 0x365   :  { %v2101_v20 = vpop.xlane.xlu1 %2100 }
 0x366   :  { %v2123_v21 = vsub.f32 %v2090_v1, %v2101_v20 }
 0x368   :  { %v2131_v13 = vmul.f32 1.442695, %v2123_v21 }
 0x369   :  { %v2104_v7 = vpop.xlane.xlu0 %2103 }
 0x36a   :  { %3693 = vpow2.f32 %v2131_v13  ;;  %v2124_v23 = vsub.f32 %v2091_v6, %v2104_v7 }
 0x36c   :  { %v2133_v24 = vmul.f32 1.442695, %v2124_v23 }
 0x36e   :  { %3695 = vpow2.f32 %v2133_v24 }
 0x372   :  { %v2107_v48 = vpop.xlane.xlu0 %2106 }
 0x373   :  { %v2125_v40 = vsub.f32 %v2092_v15, %v2107_v48 }
 0x374   :  { %v3694_v41 = vpop.eup %3693 }
 0x375   :  { %v2135_v45 = vmul.f32 1.442695, %v2125_v40  ;;  %v4368_v60 = vsel %vm4309_vm2, %v3694_v41, 0.0 }
 0x376   :  { %v2110_v61 = vpop.xlane.xlu1 %2109  ;;  %v2155_v62 = vsel %vm2098_vm3, %v4368_v60, 0.0 }
 0x377   :  { %3697 = vpow2.f32 %v2135_v45  ;;  %v2126_v63 = vsub.f32 %v2093_v5, %v2110_v61  ;;  %2156 = vadd.xlane.f32.xlu0 %v2155_v62 }
 0x378   :  { %v3696_v22 = vpop.eup %3695 }
 0x379   :  { %v2137_v0 = vmul.f32 1.442695, %v2126_v63  ;;  %v4374_v25 = vsel %vm4309_vm2, %v3696_v22, 0.0 }
 0x37a   :  { %v2113_v1 = vpop.xlane.xlu0 %2112  ;;  %v2158_v27 = vsel %vm2098_vm3, %v4374_v25, 0.0 }
 0x37b   :  { %3699 = vpow2.f32 %v2137_v0  ;;  %v2127_v2 = vsub.f32 %v2094_v29, %v2113_v1  ;;  %2159 = vadd.xlane.f32.xlu1 %v2158_v27 }
 0x37d   :  { %v2139_v4 = vmul.f32 1.442695, %v2127_v2 }
 0x37e   :  { %v2116_v6 = vpop.xlane.xlu1 %2115 }
 0x37f   :  { %3701 = vpow2.f32 %v2139_v4  ;;  %v2128_v11 = vsub.f32 %v2095_v38, %v2116_v6 }
 0x381   :  { %v3698_v8 = vpop.eup %3697  ;;  %v2141_v14 = vmul.f32 1.442695, %v2128_v11 }
 0x382   :  { %v2119_v15 = vpop.xlane.xlu0 %2118  ;;  %v4380_v28 = vsel %vm4309_vm2, %v3698_v8, 0.0 }
 0x383   :  { %3703 = vpow2.f32 %v2141_v14  ;;  %v2129_v31 = vsub.f32 %v2096_v52, %v2119_v15  ;;  %v2161_v32 = vsel %vm2098_vm3, %v4380_v28, 0.0 }
 0x384   :  { %2162 = vadd.xlane.f32.xlu0 %v2161_v32 }
 0x385   :  { %v3700_v46 = vpop.eup %3699  ;;  %v2143_v5 = vmul.f32 1.442695, %v2129_v31 }
 0x386   :  { %v2122_v47 = vpop.xlane.xlu1 %2121  ;;  %v4386_v50 = vsel %vm4309_vm2, %v3700_v46, 0.0  ;;  %v1158_v29 = vpop.permute.xlu0 %1157 }
 0x387   :  { %3705 = vpow2.f32 %v2143_v5  ;;  %v2164_v51 = vsel %vm2098_vm3, %v4386_v50, 0.0 }
 0x388   :  { %2165 = vadd.xlane.f32.xlu1 %v2164_v51  ;;  %v567_v51 = vadd.f32 %v4362_v59, %v4347_v18 }
 0x389   :  { %v3702_v30 = vpop.eup %3701 }
 0x38a   :  { %v1150_v38 = vpop.permute.xlu1 %1149  ;;  %v4396_v39 = vsel %vm4324_vm4, %v3702_v30, 0.0  ;;  %v2130_v30 = vsub.f32 %v4340_v57, %v2122_v47 }
 0x38b   :  { %v1179_v26 = vcombine.low %v1150_v38, %v1158_v29  ;;  %v1180_v42 = vcombine.high %v1150_v38, %v1158_v29  ;;  %v2167_v43 = vsel %vm2098_vm3, %v4396_v39, 0.0  ;;  %v569_v29 = vadd.f32 %v4364_v9, %v4350_v19 }
 0x38c   :  { %2168 = vadd.xlane.f32.xlu0 %v2167_v43  ;;  %v2145_v34 = vmul.f32 1.442695, %v2130_v30 }
 0x38d   :  { %v3704_v52 = vpop.eup %3703  ;;  %v1187_v56 = vrot.slane %v1179_v26, %v4115_v33  ;;  %v1194_v44 = vrot.slane %v1180_v42, %v4115_v33 }
 0x38e   :  { %v4406_v16 = vsel %vm4324_vm4, %v3704_v52, 0.0  ;;  %3707 = vpow2.f32 %v2145_v34 }
 0x38f   :  { %v1195_v17 = vcombine.low %v1171_v53, %v1187_v56  ;;  %v1196_v36 = vcombine.high %v1171_v53, %v1187_v56  ;;  %v1211_v3 = vcombine.low %v1178_v55, %v1194_v44  ;;  %v1212_v58 = vcombine.high %v1178_v55, %v1194_v44 }
 0x390   :  { %v2170_v20 = vsel %vm2098_vm3, %v4406_v16, 0.0 }
 0x391   :  { %v3706_v21 = vpop.eup %3705  ;;  %v1203_v13 = vrot.slane %v1195_v17, %v4118_v37  ;;  %v1210_v7 = vrot.slane %v1196_v36, %v4118_v37  ;;  %v1219_v23 = vrot.slane %v1211_v3, %v4118_v37  ;;  %v1226_v24 = vrot.slane %v1212_v58, %v4118_v37  ;;  %2171 = vadd.xlane.f32.xlu1 %v2170_v20 }
 0x392   :  { %v4416_v48 = vsel %vm4324_vm4, %v3706_v21, 0.0  ;;  %v1231_v58 = vcombine.low %v567_v51, %v569_v29  ;;  %v1232_v20 = vcombine.high %v567_v51, %v569_v29 }
 0x393   :  { %v1299_v40 = vcombine.low %v1203_v13, %v1210_v7  ;;  %v3263_v41 = vcombine.high %v1203_v13, %v1210_v7  ;;  %v1315_v45 = vcombine.low %v1219_v23, %v1226_v24  ;;  %v3264_v61 = vcombine.high %v1219_v23, %v1226_v24 }
 0x394   :  { %v2173_v62 = vsel %vm2098_vm3, %v4416_v48, 0.0  ;;  %v1239_v24 = vrot.slane %v1231_v58, %v4115_v33 }
 0x395   :  { %v1306_v63 = vrot.slane %v1299_v40, %v4115_v33  ;;  %v1314_v22 = vrot.slane %v3263_v41, %v4115_v33  ;;  %v1322_v0 = vrot.slane %v1315_v45, %v4115_v33  ;;  %v1330_v1 = vrot.slane %v3264_v61, %v4115_v33  ;;  %2174 = vadd.xlane.f32.xlu0 %v2173_v62 }
 0x396   :  { %v1246_v40 = vrot.slane %v1232_v20, %v4115_v33 }
 0x397   :  { %v1331_v27 = vcombine.low %v1306_v63, %v1314_v22  ;;  %v1347_v2 = vcombine.low %v1322_v0, %v1330_v1  ;;  %v1332_v4 = vcombine.high %v1306_v63, %v1314_v22  ;;  %v1348_v6 = vcombine.high %v1322_v0, %v1330_v1 }
 0x398   :  { %v3708_v35 = vpop.eup %3707 }
 0x399   :  { %v1339_v11 = vrot.slane %v1331_v27, %v4118_v37  ;;  %v1355_v8 = vrot.slane %v1347_v2, %v4118_v37  ;;  %v1346_v14 = vrot.slane %v1332_v4, %v4118_v37  ;;  %v1362_v15 = vrot.slane %v1348_v6, %v4118_v37 }
 0x39a   :  { %v4438_v38 = vsel %vm4324_vm4, %v3708_v35, 0.0 }
 0x39b   :  { %v1363_v31 = vcombine.low %v1339_v11, %v1355_v8  ;;  %v1364_v32 = vcombine.high %v1339_v11, %v1355_v8  ;;  %v1365_v46 = vcombine.low %v1346_v14, %v1362_v15  ;;  %v1366_v5 = vcombine.high %v1346_v14, %v1362_v15 }
 0x39c   :  { %v2176_v18 = vsel %vm2098_vm3, %v4438_v38, 0.0 }
 0x39d   :  { %3369 = vmatpush3.msra.mxu1 %v1363_v31 }
 0x39e   :  { %3373 = vmatprep.subr.mxu1 %v3875_v54 }
 0x3a2   :  { %1151 = vrot.lane.b32.xlu1 %v567_v51, %s3874_s4 }
 0x3ab   :  { %1159 = vrot.lane.b32.xlu0 %v569_v29, %s3874_s4 }
 0x3c6   :  { %2177 = vadd.xlane.f32.xlu1 %v2176_v18 }
 0x404   :  { %v2157_v59 = vpop.xlane.xlu0 %2156 }
 0x405   :  { %v2179_v26 = vmax.f32 %v2157_v59, 1e-30 }
 0x407   :  { %3709 = vrcp.f32 %v2179_v26 }
 0x408   :  { %v2160_v42 = vpop.xlane.xlu1 %2159 }
 0x409   :  { %v2180_v19 = vmax.f32 %v2160_v42, 1e-30 }
 0x40b   :  { %3711 = vrcp.f32 %v2180_v19 }
 0x411   :  { %v3710_v9 = vpop.eup %3709  ;;  %v2163_v43 = vpop.xlane.xlu0 %2162 }
 0x412   :  { %v2181_v57 = vmax.f32 %v2163_v43, 1e-30  ;;  %v2195_v47 = vmul.f32 %v3710_v9, %v4368_v60 }
 0x414   :  { %3713 = vrcp.f32 %v2181_v57  ;;  %3371 = vmatmul.mubr.msk.f32.vlgmr.msra.gmra.mrb[20].mxu1 %vm2098_vm3, %v2195_v47 }
 0x415   :  { %v3712_v49 = vpop.eup %3711  ;;  %v2166_v52 = vpop.xlane.xlu1 %2165  ;;  %3374 = vmatpush3.msra.mxu1 %v1364_v32  ;;  %3375 = vmatprep.mubr.msk.f32.mxu1 %vm3876_vm0, %v3875_v54 }
 0x416   :  { %v2182_v53 = vmax.f32 %v2166_v52, 1e-30  ;;  %3378 = vmatprep.subr.mxu1 %v3875_v54  ;;  %v2196_v55 = vmul.f32 %v3712_v49, %v4374_v25 }
 0x418   :  { %3715 = vrcp.f32 %v2182_v53  ;;  %3376 = vmatmul.mubr.msk.f32.vlgmr.msra.gmra.mrb[22].mxu1 %vm2098_vm3, %v2196_v55 }
 0x419   :  { %3379 = vmatpush3.msra.mxu1 %v1365_v46  ;;  %3380 = vmatprep.mubr.msk.f32.mxu1 %vm3876_vm0, %v3875_v54  ;;  %v2169_v56 = vpop.xlane.xlu0 %2168 }
 0x41a   :  { %3383 = vmatprep.subr.mxu1 %v3875_v54  ;;  %v2183_v21 = vmax.f32 %v2169_v56, 1e-30  ;;  %v3080_v56 = vld [vmem:[#allocation10 + $0x8] sm:$0xff] }
 0x41c   :  { %3717 = vrcp.f32 %v2183_v21  ;;  %v3083_v21 = vld [vmem:[#allocation10 + $0x20] sm:$0xff] }
 0x41e   :  { %v3714_v60 = vpop.eup %3713  ;;  %v2172_v17 = vpop.xlane.xlu1 %2171 }
 0x41f   :  { %v2197_v44 = vmul.f32 %v3714_v60, %v4380_v28  ;;  %v2184_v45 = vmax.f32 %v2172_v17, 1e-30  ;;  %v3079_v17 = vld [vmem:[#allocation10] sm:$0xff] }
 0x421   :  { %3381 = vmatmul.mubr.msk.f32.vlgmr.msra.gmra.mrb[24].mxu1 %vm2098_vm3, %v2197_v44  ;;  %3719 = vrcp.f32 %v2184_v45  ;;  %v3082_v44 = vld [vmem:[#allocation10 + $0x18] sm:$0xff] }
 0x422   :  { %v3716_v36 = vpop.eup %3715  ;;  %v2175_v3 = vpop.xlane.xlu0 %2174  ;;  %3384 = vmatpush3.msra.mxu1 %v1366_v5  ;;  %3385 = vmatprep.mubr.msk.f32.mxu1 %vm3876_vm0, %v3875_v54 }
 0x423   :  { %v2198_v25 = vmul.f32 %v3716_v36, %v4386_v50  ;;  %3388 = vmatprep.subr.mxu1 %v3875_v54  ;;  %v1152_v13 = vpop.permute.xlu1 %1151  ;;  %v2185_v4 = vmax.f32 %v2175_v3, 1e-30  ;;  %v3600_v36 = vpack.c.bf16 %v3082_v44, %v3080_v56  ;;  %v3084_v3 = vld [vmem:[#allocation10 + $0x28] sm:$0xff]  ;;  %v3122_v56 = vld [vmem:[#allocation10 + $0x158] sm:$0xff] }
 0x425   :  { %3386 = vmatmul.mubr.msk.f32.vlgmr.msra.gmra.mrb[26].mxu1 %vm2098_vm3, %v2198_v25  ;;  %3721 = vrcp.f32 %v2185_v4  ;;  %v3086_v25 = vld [vmem:[#allocation10 + $0x38] sm:$0xff]  ;;  %3601 = vmatprep.subr.bf16.mxu0 %v3600_v36  ;;  %v3100_v4 = vld [vmem:[#allocation10 + $0xa8] sm:$0xff] }
 0x426   :  { %v1160_v28 = vpop.permute.xlu0 %1159  ;;  %3390 = vmatprep.mubr.msk.f32.mxu1 %vm3876_vm0, %v3875_v54  ;;  %v3718_v29 = vpop.eup %3717  ;;  %v3604_v20 = vpack.c.bf16 %v3086_v25, %v3084_v3  ;;  %v3119_v3 = vld [vmem:[#allocation10 + $0x140] sm:$0xff]  ;;  %v3121_v25 = vld [vmem:[#allocation10 + $0x150] sm:$0xff] }
 0x427   :  { %v1247_v7 = vcombine.low %v1152_v13, %v1160_v28  ;;  %v1248_v23 = vcombine.high %v1152_v13, %v1160_v28  ;;  %v2199_v42 = vmul.f32 %v3718_v29, %v4396_v39  ;;  %v3085_v13 = vld [vmem:[#allocation10 + $0x30] sm:$0xff]  ;;  %v3088_v28 = vld [vmem:[#allocation10 + $0x48] sm:$0xff] }
 0x428   :  { %v3105_v29 = vld [vmem:[#allocation10 + $0xd0] sm:$0xff] }
 0x429   :  { %v1255_v50 = vrot.slane %v1247_v7, %v4115_v33  ;;  %v1262_v41 = vrot.slane %v1248_v23, %v4115_v33  ;;  %v3087_v7 = vld [vmem:[#allocation10 + $0x40] sm:$0xff] }
 0x42b   :  { %v1263_v61 = vcombine.low %v1239_v24, %v1255_v50  ;;  %v1264_v62 = vcombine.high %v1239_v24, %v1255_v50  ;;  %v1279_v63 = vcombine.low %v1246_v40, %v1262_v41  ;;  %v1280_v22 = vcombine.high %v1246_v40, %v1262_v41  ;;  %v3720_v26 = vpop.eup %3719  ;;  %v3089_v24 = vld [vmem:[#allocation10 + $0x50] sm:$0xff]  ;;  %v3092_v40 = vld [vmem:[#allocation10 + $0x68] sm:$0xff]  ;;  %v3094_v50 = vld [vmem:[#allocation10 + $0x78] sm:$0xff] }
 0x42c   :  { %v2200_v57 = vmul.f32 %v3720_v26, %v4406_v16  ;;  %v3610_v41 = vpack.c.bf16 %v3089_v24, %v3087_v7  ;;  %v3612_v45 = vpack.c.bf16 %v3094_v50, %v3092_v40  ;;  %v3109_v26 = vld [vmem:[#allocation10 + $0xf0] sm:$0xff]  ;;  %v3130_v24 = vld [vmem:[#allocation10 + $0x198] sm:$0xff] }
 0x42d   :  { %v1271_v0 = vrot.slane %v1263_v61, %v4118_v37  ;;  %v1278_v1 = vrot.slane %v1264_v62, %v4118_v37  ;;  %v1287_v27 = vrot.slane %v1279_v63, %v4118_v37  ;;  %v1294_v2 = vrot.slane %v1280_v22, %v4118_v37  ;;  %v3091_v61 = vld [vmem:[#allocation10 + $0x60] sm:$0xff]  ;;  %v3093_v62 = vld [vmem:[#allocation10 + $0x70] sm:$0xff]  ;;  %v3096_v63 = vld [vmem:[#allocation10 + $0x88] sm:$0xff] }
 0x42e   :  { %v3098_v22 = vld [vmem:[#allocation10 + $0x98] sm:$0xff]  ;;  %v3125_v7 = vld [vmem:[#allocation10 + $0x170] sm:$0xff] }
 0x42f   :  { %v1367_v6 = vcombine.low %v1271_v0, %v1278_v1  ;;  %v3265_v11 = vcombine.high %v1271_v0, %v1278_v1  ;;  %v1383_v8 = vcombine.low %v1287_v27, %v1294_v2  ;;  %v3266_v14 = vcombine.high %v1287_v27, %v1294_v2  ;;  %v3722_v47 = vpop.eup %3721  ;;  %v3095_v27 = vld [vmem:[#allocation10 + $0x80] sm:$0xff]  ;;  %v3097_v2 = vld [vmem:[#allocation10 + $0x90] sm:$0xff] }
 0x430   :  { %v2201_v49 = vmul.f32 %v3722_v47, %v4416_v48  ;;  %v3081_v48 = vld [vmem:[#allocation10 + $0x10] sm:$0xff]  ;;  %v3614_v0 = vpack.c.bf16 %v3093_v62, %v3091_v61  ;;  %v3616_v1 = vpack.c.bf16 %v3098_v22, %v3096_v63  ;;  %v3132_v61 = vld [vmem:[#allocation10 + $0x1a8] sm:$0xff]  ;;  %v3134_v62 = vld [vmem:[#allocation10 + $0x1b8] sm:$0xff] }
 0x431   :  { %v1374_v15 = vrot.slane %v1367_v6, %v4115_v33  ;;  %v1382_v31 = vrot.slane %v3265_v11, %v4115_v33  ;;  %v1390_v32 = vrot.slane %v1383_v8, %v4115_v33  ;;  %v1398_v46 = vrot.slane %v3266_v14, %v4115_v33  ;;  %v3102_v6 = vld [vmem:[#allocation10 + $0xb8] sm:$0xff]  ;;  %v3099_v14 = vld [vmem:[#allocation10 + $0xa0] sm:$0xff]  ;;  %v3113_v47 = vld [vmem:[#allocation10 + $0x110] sm:$0xff] }
 0x432   :  { %v3602_v58 = vpack.c.bf16 %v3081_v48, %v3079_v17  ;;  %v3618_v11 = vpack.c.bf16 %v3097_v2, %v3095_v27  ;;  %v3620_v8 = vpack.c.bf16 %v3102_v6, %v3100_v4  ;;  %v3133_v27 = vld [vmem:[#allocation10 + $0x1b0] sm:$0xff] }
 0x433   :  { %v1399_v5 = vcombine.low %v1374_v15, %v1382_v31  ;;  %v1415_v51 = vcombine.low %v1390_v32, %v1398_v46  ;;  %v1400_v35 = vcombine.high %v1374_v15, %v1382_v31  ;;  %v1416_v18 = vcombine.high %v1390_v32, %v1398_v46  ;;  %v3101_v15 = vld [vmem:[#allocation10 + $0xb0] sm:$0xff]  ;;  %v3104_v31 = vld [vmem:[#allocation10 + $0xc8] sm:$0xff]  ;;  %v3106_v32 = vld [vmem:[#allocation10 + $0xd8] sm:$0xff] }
 0x434   :  { %3603 = vmatpush1.bf16.msra.mxu0 %v3602_v58  ;;  %v3622_v46 = vpack.c.bf16 %v3101_v15, %v3099_v14  ;;  %v3124_v58 = vld [vmem:[#allocation10 + $0x168] sm:$0xff]  ;;  %v3135_v15 = vld [vmem:[#allocation10 + $0x1c0] sm:$0xff] }
 0x435   :  { %v1407_v30 = vrot.slane %v1399_v5, %v4118_v37  ;;  %v1423_v34 = vrot.slane %v1415_v51, %v4118_v37  ;;  %v1414_v9 = vrot.slane %v1400_v35, %v4118_v37  ;;  %v1430_v43 = vrot.slane %v1416_v18, %v4118_v37  ;;  %3605 = vmatprep.subr.bf16.mxu0 %v3604_v20  ;;  %v3103_v51 = vld [vmem:[#allocation10 + $0xc0] sm:$0xff]  ;;  %v3126_v20 = vld [vmem:[#allocation10 + $0x178] sm:$0xff] }
 0x436   :  { %v3624_v5 = vpack.c.bf16 %v3106_v32, %v3104_v31  ;;  %v3626_v35 = vpack.c.bf16 %v3105_v29, %v3103_v51  ;;  %v3137_v31 = vld [vmem:[#allocation10 + $0x1d0] sm:$0xff] }
 0x437   :  { %v1431_v59 = vcombine.low %v1407_v30, %v1423_v34  ;;  %v1432_v19 = vcombine.high %v1407_v30, %v1423_v34  ;;  %v1433_v39 = vcombine.low %v1414_v9, %v1430_v43  ;;  %v1434_v52 = vcombine.high %v1414_v9, %v1430_v43  ;;  %v3108_v30 = vld [vmem:[#allocation10 + $0xe8] sm:$0xff]  ;;  %v3110_v34 = vld [vmem:[#allocation10 + $0xf8] sm:$0xff] }
 0x438   :  { %v3628_v18 = vpack.c.bf16 %v3110_v34, %v3108_v30  ;;  %v3658_v30 = vpack.c.bf16 %v3137_v31, %v3135_v15 }
 0x439   :  { %3389 = vmatpush3.msra.mxu1 %v1431_v59  ;;  %v3107_v59 = vld [vmem:[#allocation10 + $0xe0] sm:$0xff] }
 0x43a   :  { %3391 = vmatmul.mubr.msk.f32.vlgmr.msra.gmra.mrb[28].mxu1 %vm2098_vm3, %v2199_v42  ;;  %3393 = vmatprep.subr.mxu1 %v3875_v54  ;;  %v3112_v42 = vld [vmem:[#allocation10 + $0x108] sm:$0xff]  ;;  %v3630_v9 = vpack.c.bf16 %v3109_v26, %v3107_v59 }
 0x43b   :  { %3394 = vmatpush3.msra.mxu1 %v1432_v19  ;;  %3395 = vmatprep.mubr.msk.f32.mxu1 %vm3876_vm0, %v3875_v54  ;;  %v3114_v19 = vld [vmem:[#allocation10 + $0x118] sm:$0xff] }
 0x43c   :  { %3398 = vmatprep.subr.mxu1 %v3875_v54  ;;  %v3632_v43 = vpack.c.bf16 %v3114_v19, %v3112_v42 }
 0x43e   :  { %3396 = vmatmul.mubr.msk.f32.vlgmr.msra.gmra.mrb[30].mxu1 %vm2098_vm3, %v2200_v57  ;;  %v3111_v57 = vld [vmem:[#allocation10 + $0x100] sm:$0xff] }
 0x43f   :  { %3399 = vmatpush3.msra.mxu1 %v1433_v39  ;;  %3400 = vmatprep.mubr.msk.f32.mxu1 %vm3876_vm0, %v3875_v54  ;;  %v3116_v39 = vld [vmem:[#allocation10 + $0x128] sm:$0xff] }
 0x440   :  { %3403 = vmatprep.subr.mxu1 %v3875_v54 }
 0x442   :  { %3401 = vmatmul.mubr.msk.f32.vlgmr.msra.gmra.mrb[32].mxu1 %vm2098_vm3, %v2201_v49  ;;  %v3118_v49 = vld [vmem:[#allocation10 + $0x138] sm:$0xff] }
 0x443   :  { %3404 = vmatpush3.msra.mxu1 %v1434_v52  ;;  %3405 = vmatprep.mubr.msk.f32.mxu1 %vm3876_vm0, %v3875_v54  ;;  %v3606_v54 = vpack.c.bf16 %v3085_v13, %v3083_v21  ;;  %v3634_v52 = vpack.c.bf16 %v3113_v47, %v3111_v57  ;;  %v3642_v13 = vpack.c.bf16 %v3121_v25, %v3119_v3 }
 0x445   :  { %3607 = vmatpush1.bf16.msra.mxu0 %v3606_v54 }
 0x453   :  { %v2178_v16 = vpop.xlane.xlu1 %2177 }
 0x454   :  { %v2186_v53 = vmax.f32 %v2178_v16, 1e-30  ;;  %v3636_v16 = vpack.c.bf16 %v3118_v49, %v3116_v39  ;;  %v3140_v49 = vld [vmem:[#allocation10 + $0x1e8] sm:$0xff] }
 0x456   :  { %3723 = vrcp.f32 %v2186_v53  ;;  %v3115_v53 = vld [vmem:[#allocation10 + $0x120] sm:$0xff] }
 0x460   :  { %v3724_v55 = vpop.eup %3723 }
 0x461   :  { %v2202_v60 = vmul.f32 %v3724_v55, %v4438_v38  ;;  %v3090_v38 = vld [vmem:[#allocation10 + $0x58] sm:$0xff]  ;;  %v3117_v55 = vld [vmem:[#allocation10 + $0x130] sm:$0xff] }
 0x462   :  { %v3608_v23 = vpack.c.bf16 %v3090_v38, %v3088_v28  ;;  %v3638_v17 = vpack.c.bf16 %v3117_v55, %v3115_v53  ;;  %v3644_v28 = vpack.c.bf16 %v3126_v20, %v3124_v58  ;;  %v3123_v38 = vld [vmem:[#allocation10 + $0x160] sm:$0xff] }
 0x463   :  { %3406 = vmatmul.mubr.msk.f32.vlgmr.msra.gmra.mrb[34].mxu1 %vm2098_vm3, %v2202_v60  ;;  %v3120_v60 = vld [vmem:[#allocation10 + $0x148] sm:$0xff]  ;;  %v3646_v40 = vpack.c.bf16 %v3125_v7, %v3123_v38 }
 0x464   :  { %3609 = vmatprep.subr.bf16.mxu0 %v3608_v23  ;;  %v3640_v48 = vpack.c.bf16 %v3122_v56, %v3120_v60  ;;  %v3128_v23 = vld [vmem:[#allocation10 + $0x188] sm:$0xff] }
 0x465   :  { %3611 = vmatpush1.bf16.msra.mxu0 %v3610_v41  ;;  %v3648_v50 = vpack.c.bf16 %v3130_v24, %v3128_v23  ;;  %v3127_v41 = vld [vmem:[#allocation10 + $0x180] sm:$0xff] }
 0x466   :  { %3613 = vmatprep.subr.bf16.mxu0 %v3612_v45  ;;  %v3129_v45 = vld [vmem:[#allocation10 + $0x190] sm:$0xff] }
 0x467   :  { %v3650_v63 = vpack.c.bf16 %v3129_v45, %v3127_v41 }
 0x469   :  { %3615 = vmatpush1.bf16.msra.mxu0 %v3614_v0  ;;  %v3652_v0 = vpack.c.bf16 %v3134_v62, %v3132_v61 }
 0x46a   :  { %3617 = vmatprep.subr.bf16.mxu0 %v3616_v1  ;;  %v3131_v1 = vld [vmem:[#allocation10 + $0x1a0] sm:$0xff] }
 0x46b   :  { %v3654_v14 = vpack.c.bf16 %v3133_v27, %v3131_v1 }
 0x46d   :  { %3619 = vmatpush1.bf16.msra.mxu0 %v3618_v11  ;;  %v3136_v11 = vld [vmem:[#allocation10 + $0x1c8] sm:$0xff] }
 0x46e   :  { %3621 = vmatprep.subr.bf16.mxu0 %v3620_v8  ;;  %v3138_v8 = vld [vmem:[#allocation10 + $0x1d8] sm:$0xff] }
 0x471   :  { %3623 = vmatpush1.bf16.msra.mxu0 %v3622_v46  ;;  %v3656_v46 = vpack.c.bf16 %v3138_v8, %v3136_v11 }
 0x472   :  { %3625 = vmatprep.subr.bf16.mxu0 %v3624_v5 }
 0x475   :  { %3627 = vmatpush1.bf16.msra.mxu0 %v3626_v35 }
 0x476   :  { %3629 = vmatprep.subr.bf16.mxu0 %v3628_v18 }
 0x479   :  { %3631 = vmatpush1.bf16.msra.mxu0 %v3630_v9 }
 0x47a   :  { %3633 = vmatprep.subr.bf16.mxu0 %v3632_v43 }
 0x47d   :  { %3635 = vmatpush1.bf16.msra.mxu0 %v3634_v52  ;;  %v3142_v52 = vld [vmem:[#allocation10 + $0x1f8] sm:$0xff] }
 0x47e   :  { %3637 = vmatprep.subr.bf16.mxu0 %v3636_v16  ;;  %v3139_v16 = vld [vmem:[#allocation10 + $0x1e0] sm:$0xff] }
 0x481   :  { %3639 = vmatpush1.bf16.msra.mxu0 %v3638_v17  ;;  %v3660_v17 = vpack.c.bf16 %v3142_v52, %v3140_v49 }
 0x482   :  { %3641 = vmatprep.subr.bf16.mxu0 %v3640_v48 }
 0x485   :  { %3643 = vmatpush1.bf16.msra.mxu0 %v3642_v13 }
 0x486   :  { %3645 = vmatprep.subr.bf16.mxu0 %v3644_v28 }
 0x489   :  { %3647 = vmatpush1.bf16.msra.mxu0 %v3646_v40 }
 0x48a   :  { %3649 = vmatprep.subr.bf16.mxu0 %v3648_v50 }
 0x48d   :  { %3651 = vmatpush1.bf16.msra.mxu0 %v3650_v63 }
 0x48e   :  { %3653 = vmatprep.subr.bf16.mxu0 %v3652_v0 }
 0x491   :  { %3655 = vmatpush1.bf16.msra.mxu0 %v3654_v14 }
 0x492   :  { %3657 = vmatprep.subr.bf16.mxu0 %v3656_v46 }
 0x495   :  { %3659 = vmatpush1.bf16.msra.mxu0 %v3658_v30 }
 0x496   :  { %3661 = vmatprep.subr.bf16.mxu0 %v3660_v17 }
 0x4e7   :  { %v2272_v44 = vpop.f32.mrb[20].mxu1 }
 0x4e8   :  { %v3372_v36 = vpop.f32.mrb[21].mxu1 }
 0x4eb   :  { %v2345_v21 = vpop.f32.mrb[22].mxu1 }
 0x4ec   :  { %v3377_v54 = vpop.f32.mrb[23].mxu1 }
 0x4f4   :  { %v2418_v22 = vpop.f32.mrb[24].mxu1 }
 0x4f5   :  { %v2787_v2 = vcombine.low %v2272_v44, %v2418_v22  ;;  %v2788_v4 = vcombine.high %v2272_v44, %v2418_v22  ;;  %v3382_v6 = vpop.f32.mrb[25].mxu1  ;;  %v3141_v44 = vld [vmem:[#allocation10 + $0x1f0] sm:$0xff] }
 0x4f6   :  { %v3662_v36 = vpack.c.bf16 %v3141_v44, %v3139_v16 }
 0x4f7   :  { %v2795_v34 = vrot.slane %v2787_v2, %v4115_v33  ;;  %v2802_v35 = vrot.slane %v2788_v4, %v4115_v33 }
 0x4f8   :  { %v2491_v32 = vpop.f32.mrb[26].mxu1  ;;  %3663 = vmatpush1.bf16.msra.mxu0 %v3662_v36 }
 0x4f9   :  { %v2803_v5 = vcombine.low %v2345_v21, %v2491_v32  ;;  %v2804_v51 = vcombine.high %v2345_v21, %v2491_v32  ;;  %v3387_v29 = vpop.f32.mrb[27].mxu1 }
 0x4fb   :  { %v2811_v18 = vrot.slane %v2803_v5, %v4115_v33  ;;  %v2818_v59 = vrot.slane %v2804_v51, %v4115_v33 }
 0x4fd   :  { %v2819_v26 = vcombine.low %v2795_v34, %v2811_v18  ;;  %v2820_v42 = vcombine.high %v2795_v34, %v2811_v18  ;;  %v2835_v19 = vcombine.low %v2802_v35, %v2818_v59  ;;  %v2836_v9 = vcombine.high %v2802_v35, %v2818_v59 }
 0x4ff   :  { %v2827_v43 = vrot.slane %v2819_v26, %v4118_v37  ;;  %v2834_v57 = vrot.slane %v2820_v42, %v4118_v37  ;;  %v2843_v47 = vrot.slane %v2835_v19, %v4118_v37  ;;  %v2850_v39 = vrot.slane %v2836_v9, %v4118_v37 }
 0x501   :  { %v2923_v53 = vcombine.low %v2827_v43, %v2834_v57  ;;  %v3292_v55 = vcombine.high %v2827_v43, %v2834_v57  ;;  %v2939_v60 = vcombine.low %v2843_v47, %v2850_v39  ;;  %v3293_v56 = vcombine.high %v2843_v47, %v2850_v39 }
 0x503   :  { %v2930_v48 = vrot.slane %v2923_v53, %v4115_v33  ;;  %v2938_v3 = vrot.slane %v3292_v55, %v4115_v33  ;;  %v2946_v25 = vrot.slane %v2939_v60, %v4115_v33  ;;  %v2954_v58 = vrot.slane %v3293_v56, %v4115_v33 }
 0x505   :  { %v2955_v20 = vcombine.low %v2930_v48, %v2938_v3  ;;  %v2956_v21 = vcombine.high %v2930_v48, %v2938_v3  ;;  %v2971_v13 = vcombine.low %v2946_v25, %v2954_v58  ;;  %v2972_v54 = vcombine.high %v2946_v25, %v2954_v58 }
 0x507   :  { %v2963_v28 = vrot.slane %v2955_v20, %v4118_v37  ;;  %v2970_v38 = vrot.slane %v2956_v21, %v4118_v37  ;;  %v2979_v7 = vrot.slane %v2971_v13, %v4118_v37  ;;  %v2986_v23 = vrot.slane %v2972_v54, %v4118_v37 }
 0x509   :  { %v2988_v24 = vcombine.high %v2963_v28, %v2979_v7  ;;  %v2990_v40 = vcombine.high %v2970_v38, %v2986_v23  ;;  %v2987_v50 = vcombine.low %v2963_v28, %v2979_v7  ;;  %v2989_v41 = vcombine.low %v2970_v38, %v2986_v23  ;;  %v3143_v7 = vld [vmem:[%s4560_s8] sm:$0x3]  ;;  %s3835_s8 = scalar_lea.vmem %s3242_s14, 512 }
 0x50a   :  { %v3148_v23 = vrot.slane %v3143_v7, %v4035_v10  ;;  %p3836_p12 = scmp.ne.s32.totalorder %s3242_s14, %s3835_s8  ;;  %p3841_p0 = scmp.lt.s32.totalorder %s3835_s8, %s3835_s8 }
 0x50b   :  { %v3683_v45 = vpack.i.bf16 %v2988_v24, %v2990_v40  ;;  %v3152_v24 = vrot.slane %v3143_v7, %v4041_v12 }
 0x50c   :  { %p3842_p1 = por %p3841_p0, %p3840_p13 }
 0x50d   :  { %v2564_v61 = vpop.f32.mrb[28].mxu1  ;;  %3684 = vrot.lane.b32.xlu0 %v3683_v45, %s3874_s4 }
 0x50e   :  { %v3392_v62 = vpop.f32.mrb[29].mxu1  ;;  %p3843_p2 = pnand %p3842_p1, %p3836_p12 }
 0x511   :  { %v2637_v63 = vpop.f32.mrb[30].mxu1 }
 0x512   :  { %v3397_v22 = vpop.f32.mrb[31].mxu1 }
 0x515   :  { %v2710_v0 = vpop.f32.mrb[32].mxu1 }
 0x516   :  { %v2855_v1 = vcombine.low %v2564_v61, %v2710_v0  ;;  %v2856_v27 = vcombine.high %v2564_v61, %v2710_v0  ;;  %v3402_v2 = vpop.f32.mrb[33].mxu1 }
 0x518   :  { %v2863_v14 = vrot.slane %v2855_v1, %v4115_v33  ;;  %v2870_v15 = vrot.slane %v2856_v27, %v4115_v33 }
 0x536   :  { %v2783_v4 = vpop.f32.mrb[34].mxu1 }
 0x537   :  { %v2871_v6 = vcombine.low %v2637_v63, %v2783_v4  ;;  %v2872_v11 = vcombine.high %v2637_v63, %v2783_v4  ;;  %v3407_v8 = vpop.f32.mrb[35].mxu1 }
 0x539   :  { %v2879_v31 = vrot.slane %v2871_v6, %v4115_v33  ;;  %v2886_v32 = vrot.slane %v2872_v11, %v4115_v33 }
 0x53b   :  { %v2887_v46 = vcombine.low %v2863_v14, %v2879_v31  ;;  %v2888_v5 = vcombine.high %v2863_v14, %v2879_v31  ;;  %v2903_v51 = vcombine.low %v2870_v15, %v2886_v32  ;;  %v2904_v29 = vcombine.high %v2870_v15, %v2886_v32 }
 0x53d   :  { %v2895_v30 = vrot.slane %v2887_v46, %v4118_v37  ;;  %v2902_v34 = vrot.slane %v2888_v5, %v4118_v37  ;;  %v2911_v35 = vrot.slane %v2903_v51, %v4118_v37  ;;  %v2918_v18 = vrot.slane %v2904_v29, %v4118_v37 }
 0x53f   :  { %v2991_v59 = vcombine.low %v2895_v30, %v2902_v34  ;;  %v3294_v26 = vcombine.high %v2895_v30, %v2902_v34  ;;  %v3007_v42 = vcombine.low %v2911_v35, %v2918_v18  ;;  %v3295_v19 = vcombine.high %v2911_v35, %v2918_v18 }
 0x541   :  { %v2998_v9 = vrot.slane %v2991_v59, %v4115_v33  ;;  %v3006_v43 = vrot.slane %v3294_v26, %v4115_v33  ;;  %v3014_v57 = vrot.slane %v3007_v42, %v4115_v33  ;;  %v3022_v47 = vrot.slane %v3295_v19, %v4115_v33 }
 0x543   :  { %v3023_v39 = vcombine.low %v2998_v9, %v3006_v43  ;;  %v3024_v49 = vcombine.high %v2998_v9, %v3006_v43  ;;  %v3039_v52 = vcombine.low %v3014_v57, %v3022_v47  ;;  %v3040_v16 = vcombine.high %v3014_v57, %v3022_v47 }
 0x545   :  { %v3031_v53 = vrot.slane %v3023_v39, %v4118_v37  ;;  %v3038_v55 = vrot.slane %v3024_v49, %v4118_v37  ;;  %v3047_v60 = vrot.slane %v3039_v52, %v4118_v37  ;;  %v3054_v56 = vrot.slane %v3040_v16, %v4118_v37 }
 0x547   :  { %v3056_v44 = vcombine.high %v3031_v53, %v3047_v60  ;;  %v3058_v17 = vcombine.high %v3038_v55, %v3054_v56  ;;  %v3057_v36 = vcombine.low %v3038_v55, %v3054_v56  ;;  %v3055_v48 = vcombine.low %v3031_v53, %v3047_v60 }
 0x549   :  { %v3688_v3 = vpack.i.bf16 %v3056_v44, %v3058_v17 }
 0x54b   :  { %3689 = vrot.lane.b32.xlu0 %v3688_v3, %s3874_s4 }
 0x57f   :  { %v3685_v33 = vpop.permute.xlu0 %3684 }
 0x580   :  { %v3687_v25 = vunpack.i.h.bf16 %v3685_v33  ;;  %v3686_v58 = vunpack.i.l.bf16 %v3685_v33 }
 0x582   :  { %v3077_v20 = vsel %vm1481_vm1, %v2989_v41, %v3686_v58  ;;  %v3075_v21 = vsel %vm1481_vm1, %v2987_v50, %v3687_v25 }
 0x583   :  { %3219 = vmatprep.mubr.f32.mxu0 %v3077_v20 }
 0x584   :  { %3220 = vmatmul.mubr.f32.vlgmr.msra.gmra.mrb[8].mxu0 %v3075_v21 }
 0x5bd   :  { %v3690_v13 = vpop.permute.xlu0 %3689 }
 0x5be   :  { %v3692_v54 = vunpack.i.h.bf16 %v3690_v13  ;;  %v3691_v28 = vunpack.i.l.bf16 %v3690_v13 }
 0x5c0   :  { %v3078_v37 = vsel %vm1481_vm1, %v3057_v36, %v3691_v28  ;;  %v3076_v38 = vsel %vm1481_vm1, %v3055_v48, %v3692_v54 }
 0x5c1   :  { %3225 = vmatprep.mubr.f32.mxu0 %v3078_v37 }
 0x5c2   :  { %3226 = vmatmul.mubr.f32.gmra.mrb[10].mxu0 %v3076_v38 }
 0x657   :  { %v3221_v40 = vpop.f32.mrb[8].mxu0 }
 0x658   :  { %v3222_v50 = vadd.f32 %v3221_v40, %v3148_v23  ;;  %v3223_v41 = vpop.f32.mrb[9].mxu0 }
 0x659   :  { %v3224_v45 = vadd.f32 %v3223_v41, %v3152_v24 }
 0x65a   :  { %3232 = vst [vmem:[#allocation11] sm:$0xff] %v3222_v50 }
 0x65b   :  { %3233 = vst [vmem:[#allocation11 + $0x8] sm:$0xff] %v3224_v45 }
 0x695   :  { %v3227_v61 = vpop.f32.mrb[10].mxu0 }
 0x696   :  { %v3228_v62 = vadd.f32 %v3227_v61, %v3148_v23  ;;  %v3229_v63 = vpop.f32.mrb[11].mxu0 }
 0x697   :  { %v3230_v22 = vadd.f32 %v3229_v63, %v3152_v24 }
 0x698   :  { %3234 = vst [vmem:[#allocation11 + $0x10] sm:$0xff] %v3228_v62 }
 0x699   :  { %3235 = vst [vmem:[#allocation11 + $0x18] sm:$0xff] %v3230_v22 }
 0x69a   :  { %3846 = shalt.err (!%p3843_p2)
}
 0x69b   :  { %s3847_s0 = scalar_lea.hbm %s4561_s9, 512 }
 0x69c   :  { %p3848_p3 = scmp.ne.s32.totalorder %s4561_s9, %s3847_s0  ;;  %p3851_p4 = scmp.lt.u32.totalorder %s3847_s0, %s4561_s9 }
 0x69e   :  { %p3853_p5 = pnand %p3851_p4, %p3848_p3 }
 0x6a0   :  { %3856 = shalt.err (!%p3853_p5)
}
 0x6a1   :  { %3247 = dma.vmem_to_hbm [thread:$0]  %s3242_s14, 512, %s4561_s9, [#allocation4], %s3867_s21, %s3867_s21, %s3868_s22  }
 0x6a2   :  { %3863 = dma.done.wait [#allocation4], 512  }
 0x6a3   :  { %3864 = vsyncadd [#allocation4], 4294966784 }
 0x6a4   :  { %3251 = vsyncpa [#allocation3], 1 }
 0x6a5   :  { %3252 = vsyncpa [#allocation6], 1 }
 0x6a6   :  { %3253 = vsyncpa [#allocation9], 1 }
 0x6a7   :  { %3254 = vsyncpa [#allocation4], 1 }

</bundles_post_ra>
